<compile_context>
chip_gen: v7x
topology: tpu7x:2x2x1
jax: 0.10.0
libtpu: 0.0.40
codegen_flags: <defaults>
</compile_context>

<pallas_src>
import functools

import jax
import jax.numpy as jnp
from jax.experimental import pallas as pl
from jax.experimental.pallas import tpu as pltpu


# ---------------------------------------------------------------------------
# Pallas kernel: fused partial conv (stride=1, dilation=1) + renorm + LeakyReLU
# ---------------------------------------------------------------------------
def _partial_conv_kernel(xc_ref, w_ref, b_ref, o_ref, m_ref, xpad_ref, *,
                         C_in, KH, KW, H, W, pad, TH, W_out, neg_slope):
    # xc_ref  : (1, H, W, C_in+1)        VMEM  (channels = [x..., mask])
    # w_ref   : (C_out+1, KH*KW*(C_in+1)) VMEM  (last row = ones mask-sum kernel)
    # b_ref   : (C_out, 1)               VMEM  f32 bias column
    # o_ref   : (1, C_out, TH*W_out)     VMEM  channel-major, spatial on lanes
    # m_ref   : (1, 1, TH*W_out)         VMEM  new_mask
    # xpad_ref: (H+2p, W+2p, C_in+1)     VMEM scratch (zero-padded masked input)
    C_p = C_in + 1
    C_out = o_ref.shape[1]
    i = pl.program_id(1)

    # ---- fused mask*x + zero padding, entirely in VMEM ---------------------
    xpad_ref[...] = jnp.zeros_like(xpad_ref)
    blk = xc_ref[0]                                   # (H, W, C_p) native dtype
    msk = blk[:, :, C_in:C_p]                         # (H, W, 1) raw mask
    xpad_ref[pad:pad + H, pad:pad + W, :C_in] = blk[:, :, :C_in] * msk
    xpad_ref[pad:pad + H, pad:pad + W, C_in:C_p] = msk

    # ---- im2col-in-K: one (TH*W_out, KH*KW*C_p) patch matrix ---------------
    row0 = i * TH
    taps = []
    for kh in range(KH):
        for kw in range(KW):
            p = xpad_ref[pl.ds(row0 + kh, TH), kw:kw + W_out, :]   # (TH, W_out, C_p)
            taps.append(p.reshape(TH * W_out, C_p))
    patches = jnp.concatenate(taps, axis=-1)          # (TH*W_out, KH*KW*C_p)

    # ---- single fat-K MXU matmul ("NT" orientation -> channel-major result)
    # acc[c, s] = sum_k w[c, k] * patches[s, k];  f32 accumulation, native operands.
    acc = jax.lax.dot_general(
        w_ref[...], patches,
        dimension_numbers=(((1,), (1,)), ((), ())),
        preferred_element_type=jnp.float32)           # (C_out+1, TH*W_out)

    conv = acc[:C_out, :]                             # conv(mask*x), no bias
    msum = acc[C_out:C_out + 1, :]                    # mask_sum (ones kernel)

    # ---- partial-conv renormalization + hole masking + LeakyReLU (f32) -----
    holes = msum == 0.0
    msnz = jnp.where(holes, 1.0, msum)
    out = conv / msnz + b_ref[...]                    # (C_out, TH*W_out)
    out = jnp.where(holes, 0.0, out)
    out = jnp.where(out > 0, out, neg_slope * out)    # LeakyReLU(0.2)

    o_ref[0] = out.astype(o_ref.dtype)
    m_ref[0] = jnp.where(holes, 0.0, 1.0).astype(m_ref.dtype)


# ---------------------------------------------------------------------------
# Parameter prep (plain JAX glue)
# ---------------------------------------------------------------------------
def spectral_normalize(weight, u, eps=1e-12):
    """PyTorch-style spectral norm (one power iteration) on a Conv2d weight."""
    c_out = weight.shape[0]
    w_mat = weight.reshape(c_out, -1)
    v = w_mat.T @ u
    v = v / (jnp.linalg.norm(v) + eps)
    u_new = w_mat @ v
    u_new = u_new / (jnp.linalg.norm(u_new) + eps)
    sigma = jnp.dot(u_new, w_mat @ v)
    return weight / sigma, u_new


def _pick_h_tiles(H_out, W_out):
    # Largest H_out split such that each output tile stays lane-dense
    # (TH*W_out multiple of 128) so every vst is unmasked.
    for cand in (8, 4, 2):
        if H_out % cand == 0 and ((H_out // cand) * W_out) % 128 == 0:
            return cand
    return 1


def partial_conv2d_forward(x, mask, weight, bias, u, *, stride=1, padding=1,
                           dilation=1, groups=1, neg_slope=0.2, n_h_tiles=None):
    """x: (N, C_in, H, W), mask: (N, 1, H, W). Returns (out NCHW, new_mask NCHW)."""
    assert stride == 1 and dilation == 1 and groups == 1, \
        "kernel implements stride=1, dilation=1, groups=1 (as used in LAFC)"
    # TODO(synk): strided / dilated / grouped Conv2d variants not implemented.
    N, C_in, H, W = x.shape
    C_out, C_in_w, KH, KW = weight.shape
    assert C_in_w == C_in and mask.shape == (N, 1, H, W)
    pad = int(padding)
    C_p = C_in + 1          # masked-input channels + raw-mask channel
    C_out_p = C_out + 1     # conv outputs + mask_sum channel
    H_pad, W_pad = H + 2 * pad, W + 2 * pad
    H_out, W_out = H_pad - KH + 1, W_pad - KW + 1
    HWo = H_out * W_out

    if n_h_tiles is None:
        n_h_tiles = _pick_h_tiles(H_out, W_out)
    assert H_out % n_h_tiles == 0
    TH = H_out // n_h_tiles

    # Spectral norm (one power iteration == PyTorch training-mode forward).
    w_sn, _u_new = spectral_normalize(weight, u)
    # TODO(synk): persist _u_new to mirror PyTorch's running power-iteration buffer.

    # Combined weight (C_out+1, KH*KW*(C_in+1)): conv rows + all-ones mask-sum row.
    wt = jnp.transpose(w_sn, (0, 2, 3, 1)).astype(x.dtype)       # (C_out,KH,KW,C_in)
    w_full = jnp.zeros((C_out_p, KH, KW, C_p), x.dtype)
    w_full = w_full.at[:C_out, :, :, :C_in].set(wt)
    w_full = w_full.at[C_out, :, :, C_in].set(1.0)
    w_mat = w_full.reshape(C_out_p, KH * KW * C_p)

    b_col = bias.reshape(C_out, 1).astype(jnp.float32)

    # Single NHWC input slab: lanes = [x channels..., mask].  This is the only
    # XLA-side layout op; mask*x, padding, mask_sum and the epilogue are fused
    # in-kernel and the output needs no back-transpose.
    xc = jnp.concatenate([x, mask.astype(x.dtype)], axis=1)      # (N, C_p, H, W)
    xc = jnp.transpose(xc, (0, 2, 3, 1))                         # (N, H, W, C_p)
    # TODO(synk): for large images, replace the full-image input block with a
    # manual halo DMA per H-tile so the VMEM working set stays bounded (v7x 64 MiB).

    kernel = functools.partial(
        _partial_conv_kernel, C_in=C_in, KH=KH, KW=KW, H=H, W=W,
        pad=pad, TH=TH, W_out=W_out, neg_slope=neg_slope)

    out_flat, new_mask_flat = pl.pallas_call(
        kernel,
        out_shape=(jax.ShapeDtypeStruct((N, C_out, HWo), x.dtype),
                   jax.ShapeDtypeStruct((N, 1, HWo), x.dtype)),
        grid_spec=pltpu.PrefetchScalarGridSpec(
            num_scalar_prefetch=0,
            grid=(N, n_h_tiles),
            in_specs=[
                pl.BlockSpec((1, H, W, C_p), lambda n, i: (n, 0, 0, 0)),
                pl.BlockSpec((C_out_p, KH * KW * C_p), lambda n, i: (0, 0)),
                pl.BlockSpec((C_out, 1), lambda n, i: (0, 0)),
            ],
            out_specs=(
                pl.BlockSpec((1, C_out, TH * W_out), lambda n, i: (n, 0, i)),
                pl.BlockSpec((1, 1, TH * W_out), lambda n, i: (n, 0, i)),
            ),
            scratch_shapes=[pltpu.VMEM((H_pad, W_pad, C_p), x.dtype)],
        ),
        compiler_params=pltpu.CompilerParams(
            dimension_semantics=("parallel", "parallel")),
    )(xc, w_mat, b_col)

    out = out_flat.reshape(N, C_out, H_out, W_out)
    new_mask = new_mask_flat.reshape(N, 1, H_out, W_out)
    return out, new_mask


# ---------------------------------------------------------------------------
# Pure-JAX reference (mirrors the PyTorch PartialConv2d forward)
# ---------------------------------------------------------------------------
def _reference(x, mask, weight, bias, u, *, padding=1, neg_slope=0.2):
    C_out, C_in, KH, KW = weight.shape
    w_sn, _ = spectral_normalize(weight, u)
    pad2 = ((padding, padding), (padding, padding))
    dn = ('NCHW', 'OIHW', 'NCHW')
    out = jax.lax.conv_general_dilated(x * mask, w_sn, (1, 1), pad2,
                                       dimension_numbers=dn)
    out = out + bias[None, :, None, None]
    ones_w = jnp.ones((1, 1, KH, KW), x.dtype)
    msum = jax.lax.conv_general_dilated(mask, ones_w, (1, 1), pad2,
                                        dimension_numbers=dn)
    holes = msum == 0.0
    msnz = jnp.where(holes, 1.0, msum)
    ob = bias[None, :, None, None]
    out = (out - ob) / msnz + ob
    out = jnp.where(holes, 0.0, out)
    out = jnp.where(out > 0, out, neg_slope * out)
    new_mask = jnp.where(holes, 0.0, jnp.ones_like(msum))
    return out, new_mask


if __name__ == "__main__":
    key = jax.random.PRNGKey(0)
    kx, km, kw, kb, ku = jax.random.split(key, 5)

    N, C_in, H, W = 2, 4, 16, 16
    C_out, K = 8, 3
    padding = 1

    x = jax.random.normal(kx, (N, C_in, H, W), jnp.float32)

    # Binary mask with a large hole region so that mask_sum==0 positions exist.
    mask = (jax.random.uniform(km, (N, 1, H, W)) > 0.25).astype(jnp.float32)
    mask = mask.at[:, :, 5:12, 5:12].set(0.0)

    # Deterministic Conv2d-style init (uniform in [-1/sqrt(fan_in), 1/sqrt(fan_in)]).
    fan_in = C_in * K * K
    bound = float(1.0 / (fan_in ** 0.5))
    weight = jax.random.uniform(kw, (C_out, C_in, K, K), jnp.float32, -bound, bound)
    bias = jax.random.uniform(kb, (C_out,), jnp.float32, -bound, bound)

    # Spectral-norm power-iteration vector u (PyTorch inits ~N(0,1), normalized).
    u = jax.random.normal(ku, (C_out,), jnp.float32)
    u = u / (jnp.linalg.norm(u) + 1e-12)

    out, new_mask = partial_conv2d_forward(x, mask, weight, bias, u,
                                           padding=padding)
    out = jax.block_until_ready(out)
    new_mask = jax.block_until_ready(new_mask)

    ref_out, ref_mask = _reference(x, mask, weight, bias, u, padding=padding)
    ref_out = jax.block_until_ready(ref_out)

    assert out.shape == (N, C_out, H, W), out.shape
    assert new_mask.shape == (N, 1, H, W), new_mask.shape
    assert jnp.allclose(out, ref_out, atol=1e-3, rtol=1e-3), \
        float(jnp.max(jnp.abs(out - ref_out)))
    assert jnp.allclose(new_mask, ref_mask, atol=1e-5), \
        float(jnp.max(jnp.abs(new_mask - ref_mask)))

    print("KERNEL_OK")
</pallas_src>

<mosaic_0001>
module attributes {stable_mosaic.version = 11 : i64} {
  func.func @_partial_conv_kernel(%arg0: i32, %arg1: i32, %arg2: memref<1x16x16x5xf32, #tpu.memory_space<vmem>>, %arg3: memref<9x45xf32, #tpu.memory_space<vmem>>, %arg4: memref<8x1xf32, #tpu.memory_space<vmem>>, %arg5: memref<1x8x128xf32, #tpu.memory_space<vmem>>, %arg6: memref<1x1x128xf32, #tpu.memory_space<vmem>>, %arg7: memref<18x18x5xf32, #tpu.memory_space<vmem>>) attributes {dimension_semantics = [#tpu.dimension_semantics<parallel>, #tpu.dimension_semantics<parallel>], iteration_bounds = array<i64: 2, 2>, scalar_prefetch = 0 : i64, scratch_operands = 1 : i64, tpu.core_type = #tpu.core_type<tc>, window_params = [{transform_indices = @transform_0, window_bounds = array<i64: 1, 16, 16, 5>}, {pipeline_mode = #tpu.pipeline_mode<synchronous>, transform_indices = @transform_1, window_bounds = array<i64: 9, 45>}, {pipeline_mode = #tpu.pipeline_mode<synchronous>, transform_indices = @transform_2, window_bounds = array<i64: 8, 1>}, {transform_indices = @transform_3, window_bounds = array<i64: 1, 8, 128>}, {transform_indices = @transform_4, window_bounds = array<i64: 1, 1, 128>}]} {
    %cst = arith.constant 0.000000e+00 : f32
    %0 = vector.broadcast %cst : f32 to vector<18x18x5xf32>
    %c0 = arith.constant 0 : index
    %c0_0 = arith.constant 0 : index
    %c0_1 = arith.constant 0 : index
    %1 = vector.load %arg7[%c0, %c0_0, %c0_1] : memref<18x18x5xf32, #tpu.memory_space<vmem>>, vector<18x18x5xf32>
    tpu.vector_store %arg7[%c0, %c0_0, %c0_1], %0 {strides = array<i32>} : memref<18x18x5xf32, #tpu.memory_space<vmem>>, vector<18x18x5xf32>,
    %c0_2 = arith.constant 0 : index
    %c0_3 = arith.constant 0 : index
    %c0_4 = arith.constant 0 : index
    %c0_5 = arith.constant 0 : index
    %2 = vector.load %arg2[%c0_2, %c0_3, %c0_4, %c0_5] : memref<1x16x16x5xf32, #tpu.memory_space<vmem>>, vector<1x16x16x5xf32>
    %3 = vector.shape_cast %2 : vector<1x16x16x5xf32> to vector<16x16x5xf32>
    %4 = vector.extract_strided_slice %3 {offsets = [0, 0, 4], sizes = [16, 16, 1], strides = [1, 1, 1]} : vector<16x16x5xf32> to vector<16x16x1xf32>
    %5 = vector.extract_strided_slice %3 {offsets = [0, 0, 0], sizes = [16, 16, 4], strides = [1, 1, 1]} : vector<16x16x5xf32> to vector<16x16x4xf32>
    %6 = vector.broadcast %4 : vector<16x16x1xf32> to vector<16x16x4xf32>
    %7 = arith.mulf %5, %6 : vector<16x16x4xf32>
    %c1 = arith.constant 1 : index
    %c1_6 = arith.constant 1 : index
    %c0_7 = arith.constant 0 : index
    %8 = vector.load %arg7[%c1, %c1_6, %c0_7] : memref<18x18x5xf32, #tpu.memory_space<vmem>>, vector<16x16x4xf32>
    tpu.vector_store %arg7[%c1, %c1_6, %c0_7], %7 {strides = array<i32>} : memref<18x18x5xf32, #tpu.memory_space<vmem>>, vector<16x16x4xf32>,
    %c1_8 = arith.constant 1 : index
    %c1_9 = arith.constant 1 : index
    %c4 = arith.constant 4 : index
    %9 = vector.load %arg7[%c1_8, %c1_9, %c4] : memref<18x18x5xf32, #tpu.memory_space<vmem>>, vector<16x16x1xf32>
    tpu.vector_store %arg7[%c1_8, %c1_9, %c4], %4 {strides = array<i32>} : memref<18x18x5xf32, #tpu.memory_space<vmem>>, vector<16x16x1xf32>,
    %c8_i32 = arith.constant 8 : i32
    %10 = arith.muli %arg1, %c8_i32 : i32
    %c0_i32 = arith.constant 0 : i32
    %11 = arith.addi %10, %c0_i32 : i32
    %12 = arith.index_cast %11 : i32 to index
    %c0_10 = arith.constant 0 : index
    %c0_11 = arith.constant 0 : index
    %13 = vector.load %arg7[%12, %c0_10, %c0_11] : memref<18x18x5xf32, #tpu.memory_space<vmem>>, vector<8x16x5xf32>
    %14 = vector.shape_cast %13 : vector<8x16x5xf32> to vector<128x5xf32>
    %c0_i32_12 = arith.constant 0 : i32
    %15 = arith.addi %10, %c0_i32_12 : i32
    %16 = arith.index_cast %15 : i32 to index
    %c1_13 = arith.constant 1 : index
    %c0_14 = arith.constant 0 : index
    %17 = vector.load %arg7[%16, %c1_13, %c0_14] : memref<18x18x5xf32, #tpu.memory_space<vmem>>, vector<8x16x5xf32>
    %18 = vector.shape_cast %17 : vector<8x16x5xf32> to vector<128x5xf32>
    %c0_i32_15 = arith.constant 0 : i32
    %19 = arith.addi %10, %c0_i32_15 : i32
    %20 = arith.index_cast %19 : i32 to index
    %c2 = arith.constant 2 : index
    %c0_16 = arith.constant 0 : index
    %21 = vector.load %arg7[%20, %c2, %c0_16] : memref<18x18x5xf32, #tpu.memory_space<vmem>>, vector<8x16x5xf32>
    %22 = vector.shape_cast %21 : vector<8x16x5xf32> to vector<128x5xf32>
    %c1_i32 = arith.constant 1 : i32
    %23 = arith.addi %10, %c1_i32 : i32
    %24 = arith.index_cast %23 : i32 to index
    %c0_17 = arith.constant 0 : index
    %c0_18 = arith.constant 0 : index
    %25 = vector.load %arg7[%24, %c0_17, %c0_18] : memref<18x18x5xf32, #tpu.memory_space<vmem>>, vector<8x16x5xf32>
    %26 = vector.shape_cast %25 : vector<8x16x5xf32> to vector<128x5xf32>
    %c1_i32_19 = arith.constant 1 : i32
    %27 = arith.addi %10, %c1_i32_19 : i32
    %28 = arith.index_cast %27 : i32 to index
    %c1_20 = arith.constant 1 : index
    %c0_21 = arith.constant 0 : index
    %29 = vector.load %arg7[%28, %c1_20, %c0_21] : memref<18x18x5xf32, #tpu.memory_space<vmem>>, vector<8x16x5xf32>
    %30 = vector.shape_cast %29 : vector<8x16x5xf32> to vector<128x5xf32>
    %c1_i32_22 = arith.constant 1 : i32
    %31 = arith.addi %10, %c1_i32_22 : i32
    %32 = arith.index_cast %31 : i32 to index
    %c2_23 = arith.constant 2 : index
    %c0_24 = arith.constant 0 : index
    %33 = vector.load %arg7[%32, %c2_23, %c0_24] : memref<18x18x5xf32, #tpu.memory_space<vmem>>, vector<8x16x5xf32>
    %34 = vector.shape_cast %33 : vector<8x16x5xf32> to vector<128x5xf32>
    %c2_i32 = arith.constant 2 : i32
    %35 = arith.addi %10, %c2_i32 : i32
    %36 = arith.index_cast %35 : i32 to index
    %c0_25 = arith.constant 0 : index
    %c0_26 = arith.constant 0 : index
    %37 = vector.load %arg7[%36, %c0_25, %c0_26] : memref<18x18x5xf32, #tpu.memory_space<vmem>>, vector<8x16x5xf32>
    %38 = vector.shape_cast %37 : vector<8x16x5xf32> to vector<128x5xf32>
    %c2_i32_27 = arith.constant 2 : i32
    %39 = arith.addi %10, %c2_i32_27 : i32
    %40 = arith.index_cast %39 : i32 to index
    %c1_28 = arith.constant 1 : index
    %c0_29 = arith.constant 0 : index
    %41 = vector.load %arg7[%40, %c1_28, %c0_29] : memref<18x18x5xf32, #tpu.memory_space<vmem>>, vector<8x16x5xf32>
    %42 = vector.shape_cast %41 : vector<8x16x5xf32> to vector<128x5xf32>
    %c2_i32_30 = arith.constant 2 : i32
    %43 = arith.addi %10, %c2_i32_30 : i32
    %44 = arith.index_cast %43 : i32 to index
    %c2_31 = arith.constant 2 : index
    %c0_32 = arith.constant 0 : index
    %45 = vector.load %arg7[%44, %c2_31, %c0_32] : memref<18x18x5xf32, #tpu.memory_space<vmem>>, vector<8x16x5xf32>
    %46 = vector.shape_cast %45 : vector<8x16x5xf32> to vector<128x5xf32>
    %47 = tpu.concatenate %14, %18, %22, %26, %30, %34, %38, %42, %46 in 1 : vector<128x5xf32>, vector<128x5xf32>, vector<128x5xf32>, vector<128x5xf32>, vector<128x5xf32>, vector<128x5xf32>, vector<128x5xf32>, vector<128x5xf32>, vector<128x5xf32> -> vector<128x45xf32>
    %c0_33 = arith.constant 0 : index
    %c0_34 = arith.constant 0 : index
    %48 = vector.load %arg3[%c0_33, %c0_34] : memref<9x45xf32, #tpu.memory_space<vmem>>, vector<9x45xf32>
    %cst_35 = arith.constant dense<0.000000e+00> : vector<9x128xf32>
    %49 = tpu.matmul %48, %47, %cst_35 {dimension_numbers = #tpu.dot_dimension_numbers<[1], [1], [0], [0], [0, 0, 1, 0], [], []>} : vector<9x45xf32>, vector<128x45xf32>, vector<9x128xf32> -> vector<9x128xf32>
    %50 = vector.extract_strided_slice %49 {offsets = [0, 0], sizes = [8, 128], strides = [1, 1]} : vector<9x128xf32> to vector<8x128xf32>
    %51 = vector.extract_strided_slice %49 {offsets = [8, 0], sizes = [1, 128], strides = [1, 1]} : vector<9x128xf32> to vector<1x128xf32>
    %cst_36 = arith.constant 0.000000e+00 : f32
    %52 = vector.broadcast %cst_36 : f32 to vector<1x128xf32>
    %53 = arith.cmpf oeq, %51, %52 : vector<1x128xf32>
    %cst_37 = arith.constant 1.000000e+00 : f32
    %54 = vector.broadcast %cst_37 : f32 to vector<1x128xf32>
    %55 = arith.select %53, %54, %51 : vector<1x128xi1>, vector<1x128xf32>
    %56 = vector.broadcast %55 : vector<1x128xf32> to vector<8x128xf32>
    %57 = arith.divf %50, %56 : vector<8x128xf32>
    %c0_38 = arith.constant 0 : index
    %c0_39 = arith.constant 0 : index
    %58 = vector.load %arg4[%c0_38, %c0_39] : memref<8x1xf32, #tpu.memory_space<vmem>>, vector<8x1xf32>
    %59 = vector.broadcast %58 : vector<8x1xf32> to vector<8x128xf32>
    %60 = arith.addf %57, %59 : vector<8x128xf32>
    %cst_40 = arith.constant 0.000000e+00 : f32
    %61 = vector.shape_cast %53 : vector<1x128xi1> to vector<1x128xi1>
    %62 = vector.broadcast %61 : vector<1x128xi1> to vector<8x128xi1>
    %63 = vector.broadcast %cst_40 : f32 to vector<8x128xf32>
    %64 = arith.select %62, %63, %60 : vector<8x128xi1>, vector<8x128xf32>
    %cst_41 = arith.constant 0.000000e+00 : f32
    %65 = vector.broadcast %cst_41 : f32 to vector<8x128xf32>
    %66 = arith.cmpf ogt, %64, %65 : vector<8x128xf32>
    %cst_42 = arith.constant 2.000000e-01 : f32
    %67 = vector.broadcast %cst_42 : f32 to vector<8x128xf32>
    %68 = arith.mulf %67, %64 : vector<8x128xf32>
    %69 = arith.select %66, %64, %68 : vector<8x128xi1>, vector<8x128xf32>
    %c0_43 = arith.constant 0 : index
    %c0_44 = arith.constant 0 : index
    %c0_45 = arith.constant 0 : index
    %70 = vector.load %arg5[%c0_43, %c0_44, %c0_45] : memref<1x8x128xf32, #tpu.memory_space<vmem>>, vector<1x8x128xf32>
    %71 = vector.shape_cast %70 : vector<1x8x128xf32> to vector<8x128xf32>
    %72 = vector.shape_cast %69 : vector<8x128xf32> to vector<1x8x128xf32>
    tpu.vector_store %arg5[%c0_43, %c0_44, %c0_45], %72 {strides = array<i32>} : memref<1x8x128xf32, #tpu.memory_space<vmem>>, vector<1x8x128xf32>,
    %cst_46 = arith.constant 0.000000e+00 : f32
    %cst_47 = arith.constant 1.000000e+00 : f32
    %73 = vector.broadcast %cst_46 : f32 to vector<1x128xf32>
    %74 = vector.broadcast %cst_47 : f32 to vector<1x128xf32>
    %75 = arith.select %53, %73, %74 : vector<1x128xi1>, vector<1x128xf32>
    %c0_48 = arith.constant 0 : index
    %c0_49 = arith.constant 0 : index
    %c0_50 = arith.constant 0 : index
    %76 = vector.load %arg6[%c0_48, %c0_49, %c0_50] : memref<1x1x128xf32, #tpu.memory_space<vmem>>, vector<1x1x128xf32>
    %77 = vector.shape_cast %76 : vector<1x1x128xf32> to vector<1x128xf32>
    %78 = vector.shape_cast %75 : vector<1x128xf32> to vector<1x1x128xf32>
    tpu.vector_store %arg6[%c0_48, %c0_49, %c0_50], %78 {strides = array<i32>} : memref<1x1x128xf32, #tpu.memory_space<vmem>>, vector<1x1x128xf32>,
    return
  }
  func.func @transform_0(%arg0: i32, %arg1: i32) -> (i32, i32, i32, i32) {
    %c0_i32 = arith.constant 0 : i32
    %c0_i32_0 = arith.constant 0 : i32
    %c0_i32_1 = arith.constant 0 : i32
    %c0_i32_2 = arith.constant 0 : i32
    return %arg0, %c0_i32, %c0_i32_0, %c0_i32_1 : i32, i32, i32, i32
  }
  func.func @transform_1(%arg0: i32, %arg1: i32) -> (i32, i32) {
    %c0_i32 = arith.constant 0 : i32
    %c0_i32_0 = arith.constant 0 : i32
    %c0_i32_1 = arith.constant 0 : i32
    return %c0_i32, %c0_i32_0 : i32, i32
  }
  func.func @transform_2(%arg0: i32, %arg1: i32) -> (i32, i32) {
    %c0_i32 = arith.constant 0 : i32
    %c0_i32_0 = arith.constant 0 : i32
    %c0_i32_1 = arith.constant 0 : i32
    return %c0_i32, %c0_i32_0 : i32, i32
  }
  func.func @transform_3(%arg0: i32, %arg1: i32) -> (i32, i32, i32) {
    %c0_i32 = arith.constant 0 : i32
    %c0_i32_0 = arith.constant 0 : i32
    return %arg0, %c0_i32, %arg1 : i32, i32, i32
  }
  func.func @transform_4(%arg0: i32, %arg1: i32) -> (i32, i32, i32) {
    %c0_i32 = arith.constant 0 : i32
    %c0_i32_0 = arith.constant 0 : i32
    return %arg0, %c0_i32, %arg1 : i32, i32, i32
  }
}

</mosaic_0001>

<bundles_post_ra>
// kernel: tpu_custom_call.1
= control target key start
LH: loop header
LB: loop body
LE: loop exit
PB: predicated region body
PF: predicated region fallthrough
CT: control target
= control target key end

     0   :  { %10 = vsyncpa [#allocation4], 0  ;;  %s3399_s0 = inlined_call_operand.vmem [shape: f32[2,16,16,5], index: 0, kind: input, shape index: {}]   ;;  %s3400_s1 = inlined_call_operand.vmem [shape: f32[9,45], index: 1, kind: input, shape index: {}]   ;;  %s3401_s2 = inlined_call_operand.vmem [shape: f32[8,1], index: 2, kind: input, shape index: {}]   ;;  %s3402_s3 = inlined_call_operand.hbm [shape: f32[2,8,256], index: 3, kind: output, shape index: {0}]   ;;  %s3403_s4 = inlined_call_operand.hbm [shape: f32[2,1,256], index: 4, kind: output, shape index: {1}]  }
   0x1   :  { %12 = vsyncpa [#allocation4 + $0x1], 0 }
   0x2   :  { %13 = vsyncpa [#allocation6], 0 }
   0x3   :  { %15 = vsyncpa [#allocation6 + $0x1], 0  ;;  %s2493_s15 = smov 0   ;;  %s2495_s16 = smov 0  }
   0x4   :  { %s2497_s17 = smov 0   ;;  %s2499_s18 = smov 0  }
   0x5   :  { %s2501_s19 = smov 0   ;;  %s2503_s20 = smov 0  }
   0x6   :  { %s2505_s21 = smov 0   ;;  %s2507_s22 = smov 0  }
   0x7 LB: > { %s1676_s23 = sadd.s32 4294967295, %s2452_s22   ;;  %s1677_s24 = sadd.s32 4294967294, %s2452_s22   ;;  %s2452_s22 = sphi %s2507_s22, %s21_s22   ;;  %s2448_s21 = sphi %s2505_s21, %s3414_s21   ;;  %s2444_s20 = sphi %s2503_s20, %s3413_s20   ;;  %s2440_s19 = sphi %s2501_s19, %s3412_s19   ;;  %s2436_s18 = sphi %s2499_s18, %s3411_s18   ;;  %s2432_s17 = sphi %s2497_s17, %s3410_s17   ;;  %s2428_s16 = sphi %s2495_s16, %s3409_s16   ;;  %s2424_s15 = sphi %s2493_s15, %s3408_s15  }
   0x8   : > { %s30_s25 = sadd.s32 1, %s2444_s20  ;;  %s33_s26 = sadd.s32 1, %s2448_s21 }
   0x9   : > { %p31_p0 = scmp.ge.s32.totalorder %s30_s25, 2  ;;  %p120_p1 = scmp.ne.s32.totalorder %s2432_s17, %s2428_s16 }
   0xa   : > { %p121_p2 = scmp.eq.s32.totalorder %s1676_s23, 3  ;;  %p126_p5 = scmp.ne.s32.totalorder %s2428_s16, %s2424_s15 }
   0xb   : > { %s3416_s25 = smov (%p31_p0, %s30_s25), 0  ;;  %s3418_s26 = smov (!%p31_p0, %s33_s26), %s2448_s21 }
   0xc   : > { %s106_s27 = ssub.s32 %s2444_s20, %s3416_s25  ;;  %p2544_p3 = por %p121_p2, %p120_p1 }
   0xd   : > { %p35_p4 = scmp.ge.s32.totalorder %s3418_s26, 2  ;;  %p127_p6 = scmp.eq.s32.totalorder %s1677_s24, 3 }
   0xe   : > { %p1680_p7 = scmp.ge.s32.totalorder %s2452_s22, 1  ;;  %p187_p9 = scmp.lt.s32.totalorder %s2452_s22, 5 }
   0xf   : > { %s3420_s26 = smov (%p35_p4, %s3418_s26), 0  ;;  %p2553_p8 = por %p127_p6, %p126_p5 }
  0x10   : > { %s105_s30 = ssub.s32 %s2448_s21, %s3420_s26  ;;  %s110_s5 = sadd.s32 1, %s2432_s17 }
  0x11   : > { %s107_s6 = sor.u32 %s106_s27, %s105_s30  ;;  %p188_p10 = pnand %p1680_p7, %p187_p9 }
  0x12   : > { %p108_p11 = scmp.eq.s32.totalorder %s107_s6, 0  ;;  %p217_p12 = scmp.lt.s32.totalorder (!%p188_p10), %s2440_s19, 1  ;;  %vm222_vm0 = vcmask (!%p188_p10), 39936   ;;  %v2454_v0 = vmov (!%p188_p10), 4   ;;  %v2455_v1 = vmov (!%p188_p10), 0.0   ;;  %vm225_vm1 = vcmask (!%p188_p10), 33792  }
  0x13   : > { %191 = sbr.rel (%p188_p10) target bundleno = 745 (0x2e9), region = 32  ;;  %2002 = vset.pattern.permute.xlu1 (!%p188_p10), %v2454_v0  ;;  %2001 = vset.pattern.permute.xlu0 (!%p188_p10), %v2454_v0  ;;  %230 = vst.msk [vmem:[#allocation2 + $0x30] sm:$0xff] (!%p188_p10), %vm222_vm0, %v2455_v1  ;;  %231 = vst.msk [vmem:[#allocation2 + $0x38] sm:$0xff] (!%p188_p10), %vm222_vm0, %v2455_v1  ;;  %vm503_vm2 = vcmask (!%p188_p10), 31744   ;;  %vm536_vm3 = vcmask (!%p188_p10), 39968   ;;  %s2456_s23 = smov (!%p188_p10), 5  }
  0x14   : > { %s2562_s7 = scalar_select %p108_p11, %s2432_s17, %s110_s5  }
  0x15   : > { %223 = vst.msk [vmem:[#allocation2] sm:$0xff] (!%p188_p10), %vm222_vm0, %v2455_v1  ;;  %224 = vst.msk [vmem:[#allocation2 + $0x8] sm:$0xff] (!%p188_p10), %vm222_vm0, %v2455_v1  ;;  %s1685_s13 = smul.u32 (!%p188_p10), 192, %s2436_s18  ;;  %s2457_s24 = smov (!%p188_p10), 10   ;;  %vm1250_vm4 = vcmask (!%p188_p10), 80896   ;;  %vm1267_vm5 = vcmask (!%p188_p10), 121856  }
  0x16   : > { %227 = vst.msk [vmem:[#allocation2 + $0x18] sm:$0xff] (!%p188_p10), %vm222_vm0, %v2455_v1  ;;  %228 = vst.msk [vmem:[#allocation2 + $0x20] sm:$0xff] (!%p188_p10), %vm222_vm0, %v2455_v1  ;;  %s2458_s27 = smov (!%p188_p10), 15   ;;  %s2459_s30 = smov (!%p188_p10), 20   ;;  %vm1371_vm6 = vcmask (!%p188_p10), 367616   ;;  %vm1284_vm7 = vcmask (!%p188_p10), 162816  }
  0x17   : > { %233 = vst.msk [vmem:[#allocation2 + $0x48] sm:$0xff] (!%p188_p10), %vm222_vm0, %v2455_v1  ;;  %234 = vst.msk [vmem:[#allocation2 + $0x50] sm:$0xff] (!%p188_p10), %vm222_vm0, %v2455_v1  ;;  %s2938_s14 = scalar_lea.vmem (!%p188_p10), [#allocation2], %s1685_s13  ;;  %s2460_s5 = smov (!%p188_p10), 25   ;;  %vm1301_vm8 = vcmask (!%p188_p10), 203776   ;;  %vm1318_vm9 = vcmask (!%p188_p10), 244736  }
  0x18   : > { %236 = vst.msk [vmem:[#allocation2 + $0x60] sm:$0xff] (!%p188_p10), %vm222_vm0, %v2455_v1  ;;  %237 = vst.msk [vmem:[#allocation2 + $0x68] sm:$0xff] (!%p188_p10), %vm222_vm0, %v2455_v1  ;;  %s2461_s6 = smov (!%p188_p10), 30   ;;  %vm1335_vm10 = vcmask (!%p188_p10), 285696   ;;  %vm1352_vm11 = vcmask (!%p188_p10), 326656  }
  0x19   : > { %239 = vst.msk [vmem:[#allocation2 + $0x78] sm:$0xff] (!%p188_p10), %vm222_vm0, %v2455_v1  ;;  %240 = vst.msk [vmem:[#allocation2 + $0x80] sm:$0xff] (!%p188_p10), %vm222_vm0, %v2455_v1 }
  0x1a   : > { %242 = vst.msk [vmem:[#allocation2 + $0x90] sm:$0xff] %vm222_vm0, %v2455_v1  ;;  %243 = vst.msk [vmem:[#allocation2 + $0x98] sm:$0xff] %vm222_vm0, %v2455_v1  ;;  %s218_s8 = scalar_select %p217_p12, %s2440_s19, 1 }
  0x1b   : > { %245 = vst.msk [vmem:[#allocation2 + $0xa8] sm:$0xff] %vm222_vm0, %v2455_v1  ;;  %246 = vst.msk [vmem:[#allocation2 + $0xb0] sm:$0xff] %vm222_vm0, %v2455_v1 }
  0x1c   : > { %248 = vst.msk [vmem:[#allocation2 + $0xc0] sm:$0xff] %vm222_vm0, %v2455_v1  ;;  %249 = vst.msk [vmem:[#allocation2 + $0xc8] sm:$0xff] %vm222_vm0, %v2455_v1  ;;  %s1811_s9 = sshll.u32 %s218_s8, 8  ;;  %s2462_s8 = smov 35  }
  0x1d   : > { %251 = vst.msk [vmem:[#allocation2 + $0xd8] sm:$0xff] %vm222_vm0, %v2455_v1  ;;  %252 = vst.msk [vmem:[#allocation2 + $0xe0] sm:$0xff] %vm222_vm0, %v2455_v1  ;;  %s2643_s12 = scalar_lea.vmem %s3399_s0, %s1811_s9  ;;  %s2463_s9 = smov 40  }
  0x1e   : > { %254 = vst.msk [vmem:[#allocation2 + $0xf0] sm:$0xff] %vm222_vm0, %v2455_v1  ;;  %255 = vst.msk [vmem:[#allocation2 + $0xf8] sm:$0xff] %vm222_vm0, %v2455_v1  ;;  %v2646_v2 = vld [vmem:[%s2643_s12 + $0x10] sm:$0xff]  ;;  %v2649_v3 = vld [vmem:[%s2643_s12] sm:$0xff] }
  0x1f   : > { %257 = vst.msk [vmem:[#allocation2 + $0x108] sm:$0xff] %vm222_vm0, %v2455_v1  ;;  %258 = vst.msk [vmem:[#allocation2 + $0x110] sm:$0xff] %vm222_vm0, %v2455_v1  ;;  %322 = vperm.xlu1 %2002, %v2646_v2   ;;  %312 = vperm.xlu0 %2001, %v2649_v3   ;;  %v2654_v4 = vld [vmem:[%s2643_s12 + $0x18] sm:$0xff]  ;;  %v2657_v5 = vld [vmem:[%s2643_s12 + $0x8] sm:$0xff] }
  0x20   : > { %260 = vst.msk [vmem:[#allocation2 + $0x120] sm:$0xff] %vm222_vm0, %v2455_v1  ;;  %261 = vst.msk [vmem:[#allocation2 + $0x128] sm:$0xff] %vm222_vm0, %v2455_v1  ;;  %v2698_v6 = vld [vmem:[%s2643_s12 + $0x28] sm:$0xff]  ;;  %v2701_v7 = vld [vmem:[%s2643_s12 + $0x20] sm:$0xff] }
  0x21   : > { %263 = vst.msk [vmem:[#allocation2 + $0x138] sm:$0xff] %vm222_vm0, %v2455_v1  ;;  %264 = vst.msk [vmem:[#allocation2 + $0x140] sm:$0xff] %vm222_vm0, %v2455_v1  ;;  %v2706_v8 = vld [vmem:[%s2643_s12 + $0x38] sm:$0xff]  ;;  %v2709_v9 = vld [vmem:[%s2643_s12 + $0x30] sm:$0xff] }
  0x22   : > { %266 = vst.msk [vmem:[#allocation2 + $0x150] sm:$0xff] %vm222_vm0, %v2455_v1  ;;  %267 = vst.msk [vmem:[#allocation2 + $0x158] sm:$0xff] %vm222_vm0, %v2455_v1  ;;  %v2714_v10 = vld [vmem:[%s2643_s12 + $0x48] sm:$0xff]  ;;  %v2717_v11 = vld [vmem:[%s2643_s12 + $0x40] sm:$0xff] }
  0x23   : > { %269 = vst.msk [vmem:[#allocation2 + $0x168] sm:$0xff] %vm222_vm0, %v2455_v1  ;;  %270 = vst.msk [vmem:[#allocation2 + $0x170] sm:$0xff] %vm222_vm0, %v2455_v1  ;;  %327 = vperm.xlu1 %2002, %v2654_v4   ;;  %317 = vperm.xlu0 %2001, %v2657_v5   ;;  %v2722_v12 = vld [vmem:[%s2643_s12 + $0x58] sm:$0xff]  ;;  %v2725_v13 = vld [vmem:[%s2643_s12 + $0x50] sm:$0xff] }
  0x24   : > { %272 = vst.msk [vmem:[#allocation2 + $0x180] sm:$0xff] %vm222_vm0, %v2455_v1  ;;  %273 = vst.msk [vmem:[#allocation2 + $0x188] sm:$0xff] %vm222_vm0, %v2455_v1  ;;  %v2730_v14 = vld [vmem:[%s2643_s12 + $0x68] sm:$0xff]  ;;  %v2733_v15 = vld [vmem:[%s2643_s12 + $0x60] sm:$0xff] }
  0x25   : > { %275 = vst.msk [vmem:[#allocation2 + $0x198] sm:$0xff] %vm222_vm0, %v2455_v1  ;;  %276 = vst.msk [vmem:[#allocation2 + $0x1a0] sm:$0xff] %vm222_vm0, %v2455_v1  ;;  %v2738_v16 = vld [vmem:[%s2643_s12 + $0x78] sm:$0xff]  ;;  %v2741_v17 = vld [vmem:[%s2643_s12 + $0x70] sm:$0xff] }
  0x26   : > { %232 = vst.msk [vmem:[#allocation2 + $0x40] sm:$0x3] %vm225_vm1, %v2455_v1  ;;  %226 = vst.msk [vmem:[#allocation2 + $0x10] sm:$0x3] %vm225_vm1, %v2455_v1  ;;  %v2746_v18 = vld [vmem:[%s2643_s12 + $0x88] sm:$0xff]  ;;  %v2749_v19 = vld [vmem:[%s2643_s12 + $0x80] sm:$0xff] }
  0x27   : > { %229 = vst.msk [vmem:[#allocation2 + $0x28] sm:$0x3] %vm225_vm1, %v2455_v1  ;;  %235 = vst.msk [vmem:[#allocation2 + $0x58] sm:$0x3] %vm225_vm1, %v2455_v1  ;;  %337 = vperm.xlu1 %2002, %v2698_v6   ;;  %332 = vperm.xlu0 %2001, %v2701_v7   ;;  %v2754_v20 = vld [vmem:[%s2643_s12 + $0x98] sm:$0xff]  ;;  %v2757_v21 = vld [vmem:[%s2643_s12 + $0x90] sm:$0xff] }
  0x28   : > { %238 = vst.msk [vmem:[#allocation2 + $0x70] sm:$0x3] %vm225_vm1, %v2455_v1  ;;  %241 = vst.msk [vmem:[#allocation2 + $0x88] sm:$0x3] %vm225_vm1, %v2455_v1  ;;  %v2762_v22 = vld [vmem:[%s2643_s12 + $0xa8] sm:$0xff]  ;;  %v2765_v23 = vld [vmem:[%s2643_s12 + $0xa0] sm:$0xff] }
  0x29   : > { %244 = vst.msk [vmem:[#allocation2 + $0xa0] sm:$0x3] %vm225_vm1, %v2455_v1  ;;  %247 = vst.msk [vmem:[#allocation2 + $0xb8] sm:$0x3] %vm225_vm1, %v2455_v1  ;;  %v2770_v24 = vld [vmem:[%s2643_s12 + $0xb8] sm:$0xff]  ;;  %v2773_v25 = vld [vmem:[%s2643_s12 + $0xb0] sm:$0xff] }
  0x2a   : > { %250 = vst.msk [vmem:[#allocation2 + $0xd0] sm:$0x3] %vm225_vm1, %v2455_v1  ;;  %253 = vst.msk [vmem:[#allocation2 + $0xe8] sm:$0x3] %vm225_vm1, %v2455_v1  ;;  %v2778_v26 = vld [vmem:[%s2643_s12 + $0xc8] sm:$0xff]  ;;  %v2781_v27 = vld [vmem:[%s2643_s12 + $0xc0] sm:$0xff] }
  0x2b   : > { %256 = vst.msk [vmem:[#allocation2 + $0x100] sm:$0x3] %vm225_vm1, %v2455_v1  ;;  %259 = vst.msk [vmem:[#allocation2 + $0x118] sm:$0x3] %vm225_vm1, %v2455_v1  ;;  %347 = vperm.xlu1 %2002, %v2706_v8   ;;  %342 = vperm.xlu0 %2001, %v2709_v9   ;;  %v2786_v28 = vld [vmem:[%s2643_s12 + $0xd8] sm:$0xff]  ;;  %v2789_v29 = vld [vmem:[%s2643_s12 + $0xd0] sm:$0xff] }
  0x2c   : > { %262 = vst.msk [vmem:[#allocation2 + $0x130] sm:$0x3] %vm225_vm1, %v2455_v1  ;;  %265 = vst.msk [vmem:[#allocation2 + $0x148] sm:$0x3] %vm225_vm1, %v2455_v1  ;;  %v2794_v30 = vld [vmem:[%s2643_s12 + $0xe8] sm:$0xff]  ;;  %v2797_v31 = vld [vmem:[%s2643_s12 + $0xe0] sm:$0xff] }
  0x2d   : > { %268 = vst.msk [vmem:[#allocation2 + $0x160] sm:$0x3] %vm225_vm1, %v2455_v1  ;;  %271 = vst.msk [vmem:[#allocation2 + $0x178] sm:$0x3] %vm225_vm1, %v2455_v1  ;;  %v2802_v32 = vld [vmem:[%s2643_s12 + $0xf8] sm:$0xff]  ;;  %v2805_v33 = vld [vmem:[%s2643_s12 + $0xf0] sm:$0xff] }
  0x2e   : > { %274 = vst.msk [vmem:[#allocation2 + $0x190] sm:$0x3] %vm225_vm1, %v2455_v1  ;;  %277 = vst.msk [vmem:[#allocation2 + $0x1a8] sm:$0x3] %vm225_vm1, %v2455_v1  ;;  %s2466_s12 = smov [#allocation5]  }
  0x2f   : > { %357 = vperm.xlu1 %2002, %v2714_v10   ;;  %352 = vperm.xlu0 %2001, %v2717_v11   ;;  %vm3132_vm12 = vmpackc.low %vm1371_vm6, %vm1371_vm6  ;;  %s2330_s13 = sshll.u32 %s2466_s12, 4  ;;  %s2331_s13 = int_to_ptr.vmem [resolvable:$false] %s2330_s13 }
  0x33   : > { %367 = vperm.xlu1 %2002, %v2722_v12   ;;  %362 = vperm.xlu0 %2001, %v2725_v13  }
  0x37   : > { %377 = vperm.xlu1 %2002, %v2730_v14   ;;  %372 = vperm.xlu0 %2001, %v2733_v15  }
  0x3b   : > { %387 = vperm.xlu1 %2002, %v2738_v16   ;;  %382 = vperm.xlu0 %2001, %v2741_v17  }
  0x3f   : > { %397 = vperm.xlu1 %2002, %v2746_v18   ;;  %392 = vperm.xlu0 %2001, %v2749_v19  }
  0x43   : > { %407 = vperm.xlu1 %2002, %v2754_v20   ;;  %402 = vperm.xlu0 %2001, %v2757_v21  }
  0x47   : > { %417 = vperm.xlu1 %2002, %v2762_v22   ;;  %412 = vperm.xlu0 %2001, %v2765_v23  }
  0x4b   : > { %427 = vperm.xlu1 %2002, %v2770_v24   ;;  %422 = vperm.xlu0 %2001, %v2773_v25  }
  0x4f   : > { %437 = vperm.xlu1 %2002, %v2778_v26   ;;  %432 = vperm.xlu0 %2001, %v2781_v27  }
  0x53   : > { %447 = vperm.xlu1 %2002, %v2786_v28   ;;  %442 = vperm.xlu0 %2001, %v2789_v29  }
  0x57   : > { %457 = vperm.xlu1 %2002, %v2794_v30   ;;  %452 = vperm.xlu0 %2001, %v2797_v31  }
  0x5b   : > { %467 = vperm.xlu1 %2002, %v2802_v32   ;;  %462 = vperm.xlu0 %2001, %v2805_v33  }
  0x9e   : > { %v323_v34 = vpop.permute.xlu1 %322  ;;  %v313_v35 = vpop.permute.xlu0 %312 }
  0x9f   : > { %v472_v36 = vmul.f32 %v323_v34, %v2646_v2  ;;  %v470_v37 = vmul.f32 %v313_v35, %v2649_v3 }
  0xa1   : > { %506 = vst.msk [vmem:[#allocation2 + $0x31] sm:$0xff] %vm503_vm2, %v472_v36  ;;  %504 = vst.msk [vmem:[#allocation2 + $0x19] sm:$0xff] %vm503_vm2, %v470_v37 }
  0xa2   : > { %539 = vst.msk [vmem:[#allocation2 + $0x31] sm:$0xff] %vm536_vm3, %v2646_v2  ;;  %537 = vst.msk [vmem:[#allocation2 + $0x19] sm:$0xff] %vm536_vm3, %v2649_v3  ;;  %v328_v38 = vpop.permute.xlu1 %327  ;;  %v318_v39 = vpop.permute.xlu0 %317 }
  0xa3   : > { %v473_v40 = vmul.f32 %v328_v38, %v2654_v4  ;;  %v471_v41 = vmul.f32 %v318_v39, %v2657_v5 }
  0xa5   : > { %507 = vst.msk [vmem:[#allocation2 + $0x39] sm:$0xff] %vm503_vm2, %v473_v40  ;;  %505 = vst.msk [vmem:[#allocation2 + $0x21] sm:$0xff] %vm503_vm2, %v471_v41 }
  0xa6   : > { %540 = vst.msk [vmem:[#allocation2 + $0x39] sm:$0xff] %vm536_vm3, %v2654_v4  ;;  %538 = vst.msk [vmem:[#allocation2 + $0x21] sm:$0xff] %vm536_vm3, %v2657_v5  ;;  %v338_v42 = vpop.permute.xlu1 %337  ;;  %v333_v43 = vpop.permute.xlu0 %332 }
  0xa7   : > { %v475_v44 = vmul.f32 %v338_v42, %v2698_v6  ;;  %v474_v45 = vmul.f32 %v333_v43, %v2701_v7 }
  0xa9   : > { %509 = vst.msk [vmem:[#allocation2 + $0x51] sm:$0xff] %vm503_vm2, %v475_v44  ;;  %508 = vst.msk [vmem:[#allocation2 + $0x49] sm:$0xff] %vm503_vm2, %v474_v45 }
  0xaa   : > { %542 = vst.msk [vmem:[#allocation2 + $0x51] sm:$0xff] %vm536_vm3, %v2698_v6  ;;  %541 = vst.msk [vmem:[#allocation2 + $0x49] sm:$0xff] %vm536_vm3, %v2701_v7  ;;  %v348_v46 = vpop.permute.xlu1 %347  ;;  %v343_v47 = vpop.permute.xlu0 %342 }
  0xab   : > { %v477_v48 = vmul.f32 %v348_v46, %v2706_v8  ;;  %v476_v49 = vmul.f32 %v343_v47, %v2709_v9 }
  0xad   : > { %511 = vst.msk [vmem:[#allocation2 + $0x69] sm:$0xff] %vm503_vm2, %v477_v48  ;;  %510 = vst.msk [vmem:[#allocation2 + $0x61] sm:$0xff] %vm503_vm2, %v476_v49 }
  0xae   : > { %544 = vst.msk [vmem:[#allocation2 + $0x69] sm:$0xff] %vm536_vm3, %v2706_v8  ;;  %543 = vst.msk [vmem:[#allocation2 + $0x61] sm:$0xff] %vm536_vm3, %v2709_v9  ;;  %v358_v50 = vpop.permute.xlu1 %357  ;;  %v353_v51 = vpop.permute.xlu0 %352 }
  0xaf   : > { %v479_v52 = vmul.f32 %v358_v50, %v2714_v10  ;;  %v478_v53 = vmul.f32 %v353_v51, %v2717_v11 }
  0xb1   : > { %513 = vst.msk [vmem:[#allocation2 + $0x81] sm:$0xff] %vm503_vm2, %v479_v52  ;;  %512 = vst.msk [vmem:[#allocation2 + $0x79] sm:$0xff] %vm503_vm2, %v478_v53 }
  0xb2   : > { %546 = vst.msk [vmem:[#allocation2 + $0x81] sm:$0xff] %vm536_vm3, %v2714_v10  ;;  %545 = vst.msk [vmem:[#allocation2 + $0x79] sm:$0xff] %vm536_vm3, %v2717_v11  ;;  %v368_v54 = vpop.permute.xlu1 %367  ;;  %v363_v55 = vpop.permute.xlu0 %362 }
  0xb3   : > { %v481_v56 = vmul.f32 %v368_v54, %v2722_v12  ;;  %v480_v57 = vmul.f32 %v363_v55, %v2725_v13 }
  0xb5   : > { %515 = vst.msk [vmem:[#allocation2 + $0x99] sm:$0xff] %vm503_vm2, %v481_v56  ;;  %514 = vst.msk [vmem:[#allocation2 + $0x91] sm:$0xff] %vm503_vm2, %v480_v57 }
  0xb6   : > { %548 = vst.msk [vmem:[#allocation2 + $0x99] sm:$0xff] %vm536_vm3, %v2722_v12  ;;  %547 = vst.msk [vmem:[#allocation2 + $0x91] sm:$0xff] %vm536_vm3, %v2725_v13  ;;  %v378_v58 = vpop.permute.xlu1 %377  ;;  %v373_v59 = vpop.permute.xlu0 %372 }
  0xb7   : > { %v483_v60 = vmul.f32 %v378_v58, %v2730_v14  ;;  %v482_v61 = vmul.f32 %v373_v59, %v2733_v15 }
  0xb9   : > { %517 = vst.msk [vmem:[#allocation2 + $0xb1] sm:$0xff] %vm503_vm2, %v483_v60  ;;  %516 = vst.msk [vmem:[#allocation2 + $0xa9] sm:$0xff] %vm503_vm2, %v482_v61 }
  0xba   : > { %550 = vst.msk [vmem:[#allocation2 + $0xb1] sm:$0xff] %vm536_vm3, %v2730_v14  ;;  %549 = vst.msk [vmem:[#allocation2 + $0xa9] sm:$0xff] %vm536_vm3, %v2733_v15  ;;  %v388_v62 = vpop.permute.xlu1 %387  ;;  %v383_v63 = vpop.permute.xlu0 %382 }
  0xbb   : > { %v485_v0 = vmul.f32 %v388_v62, %v2738_v16  ;;  %v484_v1 = vmul.f32 %v383_v63, %v2741_v17 }
  0xbd   : > { %519 = vst.msk [vmem:[#allocation2 + $0xc9] sm:$0xff] %vm503_vm2, %v485_v0  ;;  %518 = vst.msk [vmem:[#allocation2 + $0xc1] sm:$0xff] %vm503_vm2, %v484_v1 }
  0xbe   : > { %552 = vst.msk [vmem:[#allocation2 + $0xc9] sm:$0xff] %vm536_vm3, %v2738_v16  ;;  %551 = vst.msk [vmem:[#allocation2 + $0xc1] sm:$0xff] %vm536_vm3, %v2741_v17  ;;  %v398_v2 = vpop.permute.xlu1 %397  ;;  %v393_v3 = vpop.permute.xlu0 %392 }
  0xbf   : > { %v487_v4 = vmul.f32 %v398_v2, %v2746_v18  ;;  %v486_v5 = vmul.f32 %v393_v3, %v2749_v19 }
  0xc1   : > { %521 = vst.msk [vmem:[#allocation2 + $0xe1] sm:$0xff] %vm503_vm2, %v487_v4  ;;  %520 = vst.msk [vmem:[#allocation2 + $0xd9] sm:$0xff] %vm503_vm2, %v486_v5 }
  0xc2   : > { %554 = vst.msk [vmem:[#allocation2 + $0xe1] sm:$0xff] %vm536_vm3, %v2746_v18  ;;  %553 = vst.msk [vmem:[#allocation2 + $0xd9] sm:$0xff] %vm536_vm3, %v2749_v19  ;;  %v408_v6 = vpop.permute.xlu1 %407  ;;  %v403_v7 = vpop.permute.xlu0 %402 }
  0xc3   : > { %v489_v8 = vmul.f32 %v408_v6, %v2754_v20  ;;  %v488_v9 = vmul.f32 %v403_v7, %v2757_v21 }
  0xc5   : > { %523 = vst.msk [vmem:[#allocation2 + $0xf9] sm:$0xff] %vm503_vm2, %v489_v8  ;;  %522 = vst.msk [vmem:[#allocation2 + $0xf1] sm:$0xff] %vm503_vm2, %v488_v9 }
  0xc6   : > { %556 = vst.msk [vmem:[#allocation2 + $0xf9] sm:$0xff] %vm536_vm3, %v2754_v20  ;;  %555 = vst.msk [vmem:[#allocation2 + $0xf1] sm:$0xff] %vm536_vm3, %v2757_v21  ;;  %v418_v10 = vpop.permute.xlu1 %417  ;;  %v413_v11 = vpop.permute.xlu0 %412 }
  0xc7   : > { %v491_v12 = vmul.f32 %v418_v10, %v2762_v22  ;;  %v490_v13 = vmul.f32 %v413_v11, %v2765_v23 }
  0xc9   : > { %525 = vst.msk [vmem:[#allocation2 + $0x111] sm:$0xff] %vm503_vm2, %v491_v12  ;;  %524 = vst.msk [vmem:[#allocation2 + $0x109] sm:$0xff] %vm503_vm2, %v490_v13 }
  0xca   : > { %558 = vst.msk [vmem:[#allocation2 + $0x111] sm:$0xff] %vm536_vm3, %v2762_v22  ;;  %557 = vst.msk [vmem:[#allocation2 + $0x109] sm:$0xff] %vm536_vm3, %v2765_v23  ;;  %v428_v14 = vpop.permute.xlu1 %427  ;;  %v423_v15 = vpop.permute.xlu0 %422 }
  0xcb   : > { %v493_v16 = vmul.f32 %v428_v14, %v2770_v24  ;;  %v492_v17 = vmul.f32 %v423_v15, %v2773_v25 }
  0xcd   : > { %527 = vst.msk [vmem:[#allocation2 + $0x129] sm:$0xff] %vm503_vm2, %v493_v16  ;;  %526 = vst.msk [vmem:[#allocation2 + $0x121] sm:$0xff] %vm503_vm2, %v492_v17 }
  0xce   : > { %560 = vst.msk [vmem:[#allocation2 + $0x129] sm:$0xff] %vm536_vm3, %v2770_v24  ;;  %559 = vst.msk [vmem:[#allocation2 + $0x121] sm:$0xff] %vm536_vm3, %v2773_v25  ;;  %v438_v18 = vpop.permute.xlu1 %437  ;;  %v433_v19 = vpop.permute.xlu0 %432 }
  0xcf   : > { %v495_v20 = vmul.f32 %v438_v18, %v2778_v26  ;;  %v494_v21 = vmul.f32 %v433_v19, %v2781_v27 }
  0xd1   : > { %529 = vst.msk [vmem:[#allocation2 + $0x141] sm:$0xff] %vm503_vm2, %v495_v20  ;;  %528 = vst.msk [vmem:[#allocation2 + $0x139] sm:$0xff] %vm503_vm2, %v494_v21 }
  0xd2   : > { %562 = vst.msk [vmem:[#allocation2 + $0x141] sm:$0xff] %vm536_vm3, %v2778_v26  ;;  %561 = vst.msk [vmem:[#allocation2 + $0x139] sm:$0xff] %vm536_vm3, %v2781_v27  ;;  %v448_v22 = vpop.permute.xlu1 %447  ;;  %v443_v23 = vpop.permute.xlu0 %442 }
  0xd3   : > { %v497_v24 = vmul.f32 %v448_v22, %v2786_v28  ;;  %v496_v25 = vmul.f32 %v443_v23, %v2789_v29 }
  0xd5   : > { %531 = vst.msk [vmem:[#allocation2 + $0x159] sm:$0xff] %vm503_vm2, %v497_v24  ;;  %530 = vst.msk [vmem:[#allocation2 + $0x151] sm:$0xff] %vm503_vm2, %v496_v25 }
  0xd6   : > { %564 = vst.msk [vmem:[#allocation2 + $0x159] sm:$0xff] %vm536_vm3, %v2786_v28  ;;  %563 = vst.msk [vmem:[#allocation2 + $0x151] sm:$0xff] %vm536_vm3, %v2789_v29  ;;  %v458_v26 = vpop.permute.xlu1 %457  ;;  %v453_v34 = vpop.permute.xlu0 %452 }
  0xd7   : > { %v499_v27 = vmul.f32 %v458_v26, %v2794_v30  ;;  %v498_v35 = vmul.f32 %v453_v34, %v2797_v31 }
  0xd9   : > { %533 = vst.msk [vmem:[#allocation2 + $0x171] sm:$0xff] %vm503_vm2, %v499_v27  ;;  %532 = vst.msk [vmem:[#allocation2 + $0x169] sm:$0xff] %vm503_vm2, %v498_v35 }
  0xda   : > { %566 = vst.msk [vmem:[#allocation2 + $0x171] sm:$0xff] %vm536_vm3, %v2794_v30  ;;  %565 = vst.msk [vmem:[#allocation2 + $0x169] sm:$0xff] %vm536_vm3, %v2797_v31  ;;  %v468_v28 = vpop.permute.xlu1 %467  ;;  %v463_v36 = vpop.permute.xlu0 %462 }
  0xdb   : > { %v501_v29 = vmul.f32 %v468_v28, %v2802_v32  ;;  %v500_v37 = vmul.f32 %v463_v36, %v2805_v33 }
  0xdd   : > { %535 = vst.msk [vmem:[#allocation2 + $0x189] sm:$0xff] %vm503_vm2, %v501_v29  ;;  %534 = vst.msk [vmem:[#allocation2 + $0x181] sm:$0xff] %vm503_vm2, %v500_v37 }
  0xde   : > { %568 = vst.msk [vmem:[#allocation2 + $0x189] sm:$0xff] %vm536_vm3, %v2802_v32  ;;  %567 = vst.msk [vmem:[#allocation2 + $0x181] sm:$0xff] %vm536_vm3, %v2805_v33 }
  0xe5   : > { %v588_v30 = vld [vmem:[%s2938_s14 + $0x1] sm:$0xff]  ;;  %v589_v31 = vld [vmem:[%s2938_s14 + $0x9] sm:$0xff]  ;;  %v2945_v39 = vld [vmem:[%s2938_s14 + $0x18] sm:$0xff] }
  0xe6   : > { %v604_v38 = vld [vmem:[%s2938_s14 + $0x2] sm:$0xff]  ;;  %v2003_v32 = vpack.i.bf16 %v589_v31, %v588_v30  ;;  %v605_v33 = vld [vmem:[%s2938_s14 + $0xa] sm:$0xff]  ;;  %v1704_v42 = vld [vmem:[%s2938_s14 + $0x19] sm:$0xff] }
  0xe7   : > { %v2948_v40 = vld [vmem:[%s2938_s14 + $0x20] sm:$0xff]  ;;  %v2008_v41 = vpack.i.bf16 %v605_v33, %v604_v38  ;;  %v2959_v48 = vld [vmem:[%s2938_s14 + $0x30] sm:$0xff]  ;;  %v2962_v49 = vld [vmem:[%s2938_s14 + $0x38] sm:$0xff] }
  0xe8   : > { %v1705_v43 = vld [vmem:[%s2938_s14 + $0x21] sm:$0xff]  ;;  %2004 = vrot.lane.b32.xlu0 %v2003_v32, %s2456_s23  ;;  %v2013_v44 = vpack.i.bf16 %v2948_v40, %v2945_v39  ;;  %v2028_v51 = vpack.i.bf16 %v2962_v49, %v2959_v48  ;;  %v1754_v52 = vld [vmem:[%s2938_s14 + $0x31] sm:$0xff]  ;;  %v1755_v53 = vld [vmem:[%s2938_s14 + $0x39] sm:$0xff] }
  0xe9   : > { %2009 = vrot.lane.b32.xlu1 %v2008_v41, %s2457_s24  ;;  %v2018_v45 = vpack.i.bf16 %v1705_v43, %v1704_v42  ;;  %v1720_v46 = vld [vmem:[%s2938_s14 + $0x1a] sm:$0xff]  ;;  %v1721_v47 = vld [vmem:[%s2938_s14 + $0x22] sm:$0xff]  ;;  %v1770_v54 = vld [vmem:[%s2938_s14 + $0x32] sm:$0xff]  ;;  %v2033_v56 = vpack.i.bf16 %v1755_v53, %v1754_v52 }
  0xea   : > { %v2023_v50 = vpack.i.bf16 %v1721_v47, %v1720_v46  ;;  %v1771_v55 = vld [vmem:[%s2938_s14 + $0x3a] sm:$0xff]  ;;  %v2979_v58 = vld [vmem:[%s2938_s14 + $0x48] sm:$0xff]  ;;  %v2982_v59 = vld [vmem:[%s2938_s14 + $0x50] sm:$0xff] }
  0xeb   : > { %v2038_v57 = vpack.i.bf16 %v1771_v55, %v1770_v54  ;;  %v2068_v60 = vpack.i.bf16 %v2982_v59, %v2979_v58  ;;  %v1756_v61 = vld [vmem:[%s2938_s14 + $0x49] sm:$0xff]  ;;  %v1757_v62 = vld [vmem:[%s2938_s14 + $0x51] sm:$0xff]  ;;  %v2999_v3 = vld [vmem:[%s2938_s14 + $0x60] sm:$0xff] }
  0xec   : > { %2014 = vrot.lane.b32.xlu0 %v2013_v44, %s2458_s27  ;;  %v1772_v63 = vld [vmem:[%s2938_s14 + $0x4a] sm:$0xff]  ;;  %v1773_v0 = vld [vmem:[%s2938_s14 + $0x52] sm:$0xff]  ;;  %v2073_v1 = vpack.i.bf16 %v1757_v62, %v1756_v61  ;;  %v1758_v6 = vld [vmem:[%s2938_s14 + $0x61] sm:$0xff] }
  0xed   : > { %2019 = vrot.lane.b32.xlu1 %v2018_v45, %s2459_s30  ;;  %v2078_v2 = vpack.i.bf16 %v1773_v0, %v1772_v63  ;;  %v3002_v4 = vld [vmem:[%s2938_s14 + $0x68] sm:$0xff]  ;;  %v3019_v12 = vld [vmem:[%s2938_s14 + $0x78] sm:$0xff]  ;;  %v3022_v13 = vld [vmem:[%s2938_s14 + $0x80] sm:$0xff] }
  0xee   : > { %v2108_v5 = vpack.i.bf16 %v3002_v4, %v2999_v3  ;;  %v1759_v7 = vld [vmem:[%s2938_s14 + $0x69] sm:$0xff]  ;;  %v2148_v14 = vpack.i.bf16 %v3022_v13, %v3019_v12  ;;  %v1760_v15 = vld [vmem:[%s2938_s14 + $0x79] sm:$0xff]  ;;  %v1761_v16 = vld [vmem:[%s2938_s14 + $0x81] sm:$0xff] }
  0xef   : > { %v1774_v8 = vld [vmem:[%s2938_s14 + $0x62] sm:$0xff]  ;;  %v1775_v9 = vld [vmem:[%s2938_s14 + $0x6a] sm:$0xff]  ;;  %v2113_v10 = vpack.i.bf16 %v1759_v7, %v1758_v6  ;;  %v1776_v17 = vld [vmem:[%s2938_s14 + $0x7a] sm:$0xff]  ;;  %v2153_v19 = vpack.i.bf16 %v1761_v16, %v1760_v15 }
  0xf0   : > { %2024 = vrot.lane.b32.xlu0 %v2023_v50, %s2460_s5  ;;  %v2118_v11 = vpack.i.bf16 %v1775_v9, %v1774_v8  ;;  %v1777_v18 = vld [vmem:[%s2938_s14 + $0x82] sm:$0xff]  ;;  %v3039_v21 = vld [vmem:[%s2938_s14 + $0x90] sm:$0xff]  ;;  %v3042_v22 = vld [vmem:[%s2938_s14 + $0x98] sm:$0xff] }
  0xf1   : > { %2029 = vrot.lane.b32.xlu1 %v2028_v51, %s2461_s6  ;;  %v2158_v20 = vpack.i.bf16 %v1777_v18, %v1776_v17  ;;  %v2188_v23 = vpack.i.bf16 %v3042_v22, %v3039_v21  ;;  %v1762_v24 = vld [vmem:[%s2938_s14 + $0x91] sm:$0xff]  ;;  %v1763_v25 = vld [vmem:[%s2938_s14 + $0x99] sm:$0xff]  ;;  %v3059_v28 = vld [vmem:[%s2938_s14 + $0xa8] sm:$0xff] }
  0xf2   : > { %v1778_v26 = vld [vmem:[%s2938_s14 + $0x92] sm:$0xff]  ;;  %v1779_v34 = vld [vmem:[%s2938_s14 + $0x9a] sm:$0xff]  ;;  %v2193_v27 = vpack.i.bf16 %v1763_v25, %v1762_v24  ;;  %v1764_v37 = vld [vmem:[%s2938_s14 + $0xa9] sm:$0xff] }
  0xf3   : > { %v2198_v35 = vpack.i.bf16 %v1779_v34, %v1778_v26  ;;  %v3062_v36 = vld [vmem:[%s2938_s14 + $0xb0] sm:$0xff]  ;;  %v1750_v41 = vld [vmem:[%s2938_s14 + $0xc0] sm:$0xff]  ;;  %v1751_v42 = vld [vmem:[%s2938_s14 + $0xc8] sm:$0xff] }
  0xf4   : > { %2034 = vrot.lane.b32.xlu0 %v2033_v56, %s2462_s8  ;;  %v2228_v29 = vpack.i.bf16 %v3062_v36, %v3059_v28  ;;  %v1765_v30 = vld [vmem:[%s2938_s14 + $0xb1] sm:$0xff]  ;;  %v2268_v43 = vpack.i.bf16 %v1751_v42, %v1750_v41  ;;  %v1766_v44 = vld [vmem:[%s2938_s14 + $0xc1] sm:$0xff]  ;;  %v1768_v0 = vld [vmem:[%s2938_s14 + $0xd9] sm:$0xff]  ;;  %v2464_v42 = vmov 0  }
  0xf5   : > { %2039 = vrot.lane.b32.xlu1 %v2038_v57, %s2463_s9  ;;  %v1780_v31 = vld [vmem:[%s2938_s14 + $0xaa] sm:$0xff]  ;;  %v1781_v38 = vld [vmem:[%s2938_s14 + $0xb2] sm:$0xff]  ;;  %v2233_v32 = vpack.i.bf16 %v1765_v30, %v1764_v37  ;;  %v1782_v46 = vld [vmem:[%s2938_s14 + $0xc2] sm:$0xff]  ;;  %2323 = vset.pattern.permute.xlu0 %v2464_v42 }
  0xf6   : > { %v2238_v33 = vpack.i.bf16 %v1781_v38, %v1780_v31  ;;  %v1783_v47 = vld [vmem:[%s2938_s14 + $0xca] sm:$0xff]  ;;  %v572_v52 = vld [vmem:[%s2938_s14] sm:$0xff]  ;;  %v1752_v55 = vld [vmem:[%s2938_s14 + $0xd8] sm:$0xff] }
  0xf7   : > { %v573_v54 = vld [vmem:[%s2938_s14 + $0x8] sm:$0xff]  ;;  %v1784_v8 = vld [vmem:[%s2938_s14 + $0xda] sm:$0xff] }
  0xf8   : > { %2044 = vrot.lane.b32.xlu0 %v2018_v45, %s2456_s23  ;;  %v1767_v45 = vld [vmem:[%s2938_s14 + $0xc9] sm:$0xff] }
  0xf9   : > { %2049 = vrot.lane.b32.xlu1 %v2023_v50, %s2457_s24  ;;  %v2273_v50 = vpack.i.bf16 %v1767_v45, %v1766_v44  ;;  %v1785_v9 = vld [vmem:[%s2938_s14 + $0xe2] sm:$0xff] }
  0xfa   : > { %v2318_v25 = vpack.i.bf16 %v1785_v9, %v1784_v8 }
  0xfc   : > { %2054 = vrot.lane.b32.xlu0 %v2028_v51, %s2458_s27  ;;  %v2278_v51 = vpack.i.bf16 %v1783_v47, %v1782_v46 }
  0xfd   : > { %2059 = vrot.lane.b32.xlu1 %v2033_v56, %s2459_s30 }
 0x100   : > { %2064 = vrot.lane.b32.xlu0 %v2038_v57, %s2460_s5 }
 0x101   : > { %2069 = vrot.lane.b32.xlu1 %v2068_v60, %s2461_s6 }
 0x104   : > { %2074 = vrot.lane.b32.xlu0 %v2073_v1, %s2462_s8 }
 0x105   : > { %2079 = vrot.lane.b32.xlu1 %v2078_v2, %s2463_s9 }
 0x108   : > { %2084 = vrot.lane.b32.xlu0 %v2033_v56, %s2456_s23  ;;  %v1753_v56 = vld [vmem:[%s2938_s14 + $0xe0] sm:$0xff] }
 0x109   : > { %2089 = vrot.lane.b32.xlu1 %v2038_v57, %s2457_s24  ;;  %v2308_v6 = vpack.i.bf16 %v1753_v56, %v1752_v55 }
 0x10c   : > { %2094 = vrot.lane.b32.xlu0 %v2068_v60, %s2458_s27 }
 0x10d   : > { %2099 = vrot.lane.b32.xlu1 %v2073_v1, %s2459_s30 }
 0x110   : > { %2104 = vrot.lane.b32.xlu0 %v2078_v2, %s2460_s5 }
 0x111   : > { %2109 = vrot.lane.b32.xlu1 %v2108_v5, %s2461_s6 }
 0x114   : > { %2114 = vrot.lane.b32.xlu0 %v2113_v10, %s2462_s8 }
 0x115   : > { %2119 = vrot.lane.b32.xlu1 %v2118_v11, %s2463_s9 }
 0x118   : > { %2124 = vrot.lane.b32.xlu0 %v2073_v1, %s2456_s23  ;;  %v1769_v1 = vld [vmem:[%s2938_s14 + $0xe1] sm:$0xff]  ;;  %s2332_s14 = scalar_lea.vmem %s2331_s13, 32 }
 0x119   : > { %2129 = vrot.lane.b32.xlu1 %v2078_v2, %s2457_s24  ;;  %v2313_v16 = vpack.i.bf16 %v1769_v1, %v1768_v0 }
 0x11c   : > { %2134 = vrot.lane.b32.xlu0 %v2108_v5, %s2458_s27 }
 0x11d   : > { %2139 = vrot.lane.b32.xlu1 %v2113_v10, %s2459_s30 }
 0x120   : > { %2144 = vrot.lane.b32.xlu0 %v2118_v11, %s2460_s5 }
 0x121   : > { %2149 = vrot.lane.b32.xlu1 %v2148_v14, %s2461_s6 }
 0x124   : > { %2154 = vrot.lane.b32.xlu0 %v2153_v19, %s2462_s8 }
 0x125   : > { %2159 = vrot.lane.b32.xlu1 %v2158_v20, %s2463_s9 }
 0x128   : > { %2164 = vrot.lane.b32.xlu0 %v2113_v10, %s2456_s23  ;;  %v1369_v10 = vld [vmem:[%s3400_s1] sm:$0xff] }
 0x129   : > { %2169 = vrot.lane.b32.xlu1 %v2118_v11, %s2457_s24  ;;  %1862 = vmatprep.mubr.msk.f32.mxu0 %vm1371_vm6, %v1369_v10 }
 0x12c   : > { %2174 = vrot.lane.b32.xlu0 %v2148_v14, %s2458_s27 }
 0x12d   : > { %2179 = vrot.lane.b32.xlu1 %v2153_v19, %s2459_s30 }
 0x130   : > { %2184 = vrot.lane.b32.xlu0 %v2158_v20, %s2460_s5 }
 0x131   : > { %2189 = vrot.lane.b32.xlu1 %v2188_v23, %s2461_s6 }
 0x134   : > { %2194 = vrot.lane.b32.xlu0 %v2193_v27, %s2462_s8 }
 0x135   : > { %2199 = vrot.lane.b32.xlu1 %v2198_v35, %s2463_s9 }
 0x138   : > { %2204 = vrot.lane.b32.xlu0 %v2153_v19, %s2456_s23 }
 0x139   : > { %2209 = vrot.lane.b32.xlu1 %v2158_v20, %s2457_s24 }
 0x13c   : > { %2214 = vrot.lane.b32.xlu0 %v2188_v23, %s2458_s27 }
 0x13d   : > { %2219 = vrot.lane.b32.xlu1 %v2193_v27, %s2459_s30 }
 0x140   : > { %2224 = vrot.lane.b32.xlu0 %v2198_v35, %s2460_s5 }
 0x141   : > { %2229 = vrot.lane.b32.xlu1 %v2228_v29, %s2461_s6 }
 0x144   : > { %2234 = vrot.lane.b32.xlu0 %v2233_v32, %s2462_s8 }
 0x145   : > { %2239 = vrot.lane.b32.xlu1 %v2238_v33, %s2463_s9 }
 0x148   : > { %2244 = vrot.lane.b32.xlu0 %v2193_v27, %s2456_s23 }
 0x149   : > { %2249 = vrot.lane.b32.xlu1 %v2198_v35, %s2457_s24 }
 0x14c   : > { %2254 = vrot.lane.b32.xlu0 %v2228_v29, %s2458_s27 }
 0x14d   : > { %2259 = vrot.lane.b32.xlu1 %v2233_v32, %s2459_s30 }
 0x150   : > { %2264 = vrot.lane.b32.xlu0 %v2238_v33, %s2460_s5 }
 0x151   : > { %2269 = vrot.lane.b32.xlu1 %v2268_v43, %s2461_s6 }
 0x154   : > { %2274 = vrot.lane.b32.xlu0 %v2273_v50, %s2462_s8 }
 0x155   : > { %2279 = vrot.lane.b32.xlu1 %v2278_v51, %s2463_s9 }
 0x158   : > { %2284 = vrot.lane.b32.xlu0 %v2233_v32, %s2456_s23 }
 0x159   : > { %2289 = vrot.lane.b32.xlu1 %v2238_v33, %s2457_s24  ;;  %v1509_v33 = vld [vmem:[%s3401_s2] sm:$0xff]  ;;  %s1805_s24 = sshll.u32 %s2440_s19, 1 }
 0x15a   : > { %v2005_v53 = vpop.permute.xlu0 %2004 }
 0x15b   : > { %v2007_v57 = vunpack.i.h.bf16 %v2005_v53  ;;  %v2006_v60 = vunpack.i.l.bf16 %v2005_v53  ;;  %v2010_v61 = vpop.permute.xlu1 %2009 }
 0x15c   : > { %v2012_v62 = vunpack.i.h.bf16 %v2010_v61  ;;  %v2011_v63 = vunpack.i.l.bf16 %v2010_v61  ;;  %2294 = vrot.lane.b32.xlu0 %v2268_v43, %s2458_s27  ;;  %s3300_s27 = sand.u32 1, %s2428_s16  }
 0x15d   : > { %v1234_v2 = vsel %vm222_vm0, %v572_v52, %v2006_v60  ;;  %v1235_v5 = vsel %vm222_vm0, %v573_v54, %v2007_v57  ;;  %2299 = vrot.lane.b32.xlu1 %v2273_v50, %s2459_s30  ;;  %s3303_s30 = sadd.s32 %s2436_s18, %s1805_s24  ;;  %s1535_s18 = scalar_lea.sflag [#allocation6], %s3300_s27 }
 0x15e   : > { %v2015_v7 = vpop.permute.xlu0 %2014  ;;  %v1251_v17 = vsel %vm1250_vm4, %v1234_v2, %v2011_v63  ;;  %v1252_v18 = vsel %vm1250_vm4, %v1235_v5, %v2012_v62 }
 0x15f   : > { %v2017_v11 = vunpack.i.h.bf16 %v2015_v7  ;;  %v2016_v14 = vunpack.i.l.bf16 %v2015_v7  ;;  %v2020_v15 = vpop.permute.xlu1 %2019 }
 0x160   : > { %v2022_v19 = vunpack.i.h.bf16 %v2020_v15  ;;  %v2021_v20 = vunpack.i.l.bf16 %v2020_v15  ;;  %2304 = vrot.lane.b32.xlu0 %v2278_v51, %s2460_s5  ;;  %s1808_s5 = sshll.u32 %s3303_s30, 4 }
 0x161   : > { %v1268_v23 = vsel %vm1267_vm5, %v1251_v17, %v2016_v14  ;;  %v1269_v24 = vsel %vm1267_vm5, %v1252_v18, %v2017_v11  ;;  %2309 = vrot.lane.b32.xlu1 %v2308_v6, %s2461_s6  ;;  %s216_s6 = scalar_lea.vmem [#allocation5], %s3300_s27  ;;  %s3310_s19 = scalar_lea.hbm %s3403_s4, %s1808_s5 }
 0x162   : > { %v2025_v26 = vpop.permute.xlu0 %2024  ;;  %v1285_v29 = vsel %vm1284_vm7, %v1268_v23, %v2021_v20  ;;  %v1286_v37 = vsel %vm1284_vm7, %v1269_v24, %v2022_v19 }
 0x163   : > { %v2027_v34 = vunpack.i.h.bf16 %v2025_v26  ;;  %v2026_v27 = vunpack.i.l.bf16 %v2025_v26  ;;  %v2030_v35 = vpop.permute.xlu1 %2029 }
 0x164   : > { %v2032_v30 = vunpack.i.h.bf16 %v2030_v35  ;;  %v2031_v31 = vunpack.i.l.bf16 %v2030_v35  ;;  %2314 = vrot.lane.b32.xlu0 %v2313_v16, %s2462_s8  ;;  %s1564_s8 = sshll.u32 %s216_s6, 4  ;;  %s3312_s8 = int_to_ptr.vmem [resolvable:$true] %s1564_s8 }
 0x165   : > { %v1302_v38 = vsel %vm1301_vm8, %v1285_v29, %v2026_v27  ;;  %v1303_v32 = vsel %vm1301_vm8, %v1286_v37, %v2027_v34  ;;  %2319 = vrot.lane.b32.xlu1 %v2318_v25, %s2463_s9  ;;  %s2326_s11 = scalar_lea.vmem %s3312_s8, 16  ;;  %p2333_p2 = scmp.lt.s32.totalorder %s3312_s8, %s2331_s13 }
 0x166   : > { %v2035_v41 = vpop.permute.xlu0 %2034  ;;  %v1319_v46 = vsel %vm1318_vm9, %v1302_v38, %v2031_v31  ;;  %v1320_v47 = vsel %vm1318_vm9, %v1303_v32, %v2032_v30  ;;  %p2327_p13 = scmp.ne.s32.totalorder %s3312_s8, %s2326_s11  ;;  %p2334_p4 = scmp.lt.s32.totalorder %s2332_s14, %s2326_s11 }
 0x167   : > { %v2037_v43 = vunpack.i.h.bf16 %v2035_v41  ;;  %v2036_v44 = vunpack.i.l.bf16 %v2035_v41  ;;  %v2040_v45 = vpop.permute.xlu1 %2039 }
 0x168   : > { %v2042_v50 = vunpack.i.h.bf16 %v2040_v45  ;;  %v2041_v51 = vunpack.i.l.bf16 %v2040_v45  ;;  %1512 = vperm.xlu0 %2323, %v1509_v33   ;;  %p2328_p0 = pnand %p2327_p13, %p2544_p3  ;;  %p2335_p5 = por %p2334_p4, %p2333_p2 }
 0x169   : > { %v1336_v52 = vsel %vm1335_vm10, %v1319_v46, %v2036_v44  ;;  %v1337_v53 = vsel %vm1335_vm10, %v1320_v47, %v2037_v43 }
 0x16a   : > { %v2045_v54 = vpop.permute.xlu0 %2044  ;;  %v1353_v55 = vsel %vm1352_vm11, %v1336_v52, %v2041_v51  ;;  %v1354_v56 = vsel %vm1352_vm11, %v1337_v53, %v2042_v50  ;;  %p2329_p1 = pneg %p2328_p0 }
 0x16b   : > { %v2047_v60 = vunpack.i.h.bf16 %v2045_v54  ;;  %v2046_v61 = vunpack.i.l.bf16 %v2045_v54  ;;  %v2050_v62 = vpop.permute.xlu1 %2049  ;;  %v1865_v63 = vpack.c.bf16 %v1354_v56, %v1353_v55 }
 0x16c   : > { %v2052_v0 = vunpack.i.h.bf16 %v2050_v62  ;;  %v2051_v1 = vunpack.i.l.bf16 %v2050_v62  ;;  %p2336_p6 = pnand %p2335_p5, %p2329_p1 }
 0x16d   : > { %v1236_v2 = vsel %vm222_vm0, %v2945_v39, %v2046_v61  ;;  %v1237_v5 = vsel %vm222_vm0, %v2948_v40, %v2047_v60  ;;  %1867 = vmatprep.subr.msk.bf16.mxu0 %vm3132_vm12, %v1865_v63 }
 0x16e   : > { %v2055_v6 = vpop.permute.xlu0 %2054  ;;  %1870 = vmatpush3.bf16.xpose.msk.msra.mxu0 %vm3132_vm12, %v1865_v63  ;;  %v1253_v10 = vsel %vm1250_vm4, %v1236_v2, %v2051_v1  ;;  %v1254_v11 = vsel %vm1250_vm4, %v1237_v5, %v2052_v0 }
 0x16f   : > { %v2057_v7 = vunpack.i.h.bf16 %v2055_v6  ;;  %v2056_v8 = vunpack.i.l.bf16 %v2055_v6  ;;  %v2060_v9 = vpop.permute.xlu1 %2059 }
 0x170   : > { %v2062_v14 = vunpack.i.h.bf16 %v2060_v9  ;;  %v2061_v15 = vunpack.i.l.bf16 %v2060_v9 }
 0x171   : > { %v1270_v39 = vsel %vm1267_vm5, %v1253_v10, %v2056_v8  ;;  %v1271_v40 = vsel %vm1267_vm5, %v1254_v11, %v2057_v7 }
 0x172   : > { %v2065_v16 = vpop.permute.xlu0 %2064  ;;  %v1287_v20 = vsel %vm1284_vm7, %v1270_v39, %v2061_v15  ;;  %v1288_v23 = vsel %vm1284_vm7, %v1271_v40, %v2062_v14 }
 0x173   : > { %v2067_v17 = vunpack.i.h.bf16 %v2065_v16  ;;  %v2066_v18 = vunpack.i.l.bf16 %v2065_v16  ;;  %v2070_v19 = vpop.permute.xlu1 %2069 }
 0x174   : > { %v2072_v24 = vunpack.i.h.bf16 %v2070_v19  ;;  %v2071_v25 = vunpack.i.l.bf16 %v2070_v19 }
 0x175   : > { %v1304_v26 = vsel %vm1301_vm8, %v1287_v20, %v2066_v18  ;;  %v1305_v34 = vsel %vm1301_vm8, %v1288_v23, %v2067_v17 }
 0x176   : > { %v2075_v27 = vpop.permute.xlu0 %2074  ;;  %v1321_v30 = vsel %vm1318_vm9, %v1304_v26, %v2071_v25  ;;  %v1322_v31 = vsel %vm1318_vm9, %v1305_v34, %v2072_v24 }
 0x177   : > { %v2077_v35 = vunpack.i.h.bf16 %v2075_v27  ;;  %v2076_v29 = vunpack.i.l.bf16 %v2075_v27  ;;  %v2080_v37 = vpop.permute.xlu1 %2079 }
 0x178   : > { %v2082_v38 = vunpack.i.h.bf16 %v2080_v37  ;;  %v2081_v32 = vunpack.i.l.bf16 %v2080_v37 }
 0x179   : > { %v1338_v33 = vsel %vm1335_vm10, %v1321_v30, %v2076_v29  ;;  %v1339_v41 = vsel %vm1335_vm10, %v1322_v31, %v2077_v35 }
 0x17a   : > { %v1355_v43 = vsel %vm1352_vm11, %v1338_v33, %v2081_v32  ;;  %v1356_v44 = vsel %vm1352_vm11, %v1339_v41, %v2082_v38  ;;  %v2085_v45 = vpop.permute.xlu0 %2084 }
 0x17b   : > { %v1871_v46 = vpack.c.bf16 %v1356_v44, %v1355_v43  ;;  %v2087_v47 = vunpack.i.h.bf16 %v2085_v45  ;;  %v2086_v50 = vunpack.i.l.bf16 %v2085_v45  ;;  %v2090_v51 = vpop.permute.xlu1 %2089 }
 0x17c   : > { %v2092_v52 = vunpack.i.h.bf16 %v2090_v51  ;;  %v2091_v53 = vunpack.i.l.bf16 %v2090_v51 }
 0x17d   : > { %v1238_v54 = vsel %vm222_vm0, %v2959_v48, %v2086_v50  ;;  %v1239_v55 = vsel %vm222_vm0, %v2962_v49, %v2087_v47  ;;  %1873 = vmatprep.subr.msk.bf16.mxu0 %vm3132_vm12, %v1871_v46 }
 0x17e   : > { %v2095_v56 = vpop.permute.xlu0 %2094  ;;  %1876 = vmatpush3.bf16.xpose.msk.msra.mxu0 %vm3132_vm12, %v1871_v46  ;;  %v1255_v63 = vsel %vm1250_vm4, %v1238_v54, %v2091_v53  ;;  %v1256_v0 = vsel %vm1250_vm4, %v1239_v55, %v2092_v52 }
 0x17f   : > { %v2097_v60 = vunpack.i.h.bf16 %v2095_v56  ;;  %v2096_v61 = vunpack.i.l.bf16 %v2095_v56  ;;  %v2100_v62 = vpop.permute.xlu1 %2099 }
 0x180   : > { %v2102_v1 = vunpack.i.h.bf16 %v2100_v62  ;;  %v2101_v2 = vunpack.i.l.bf16 %v2100_v62 }
 0x181   : > { %v1272_v48 = vsel %vm1267_vm5, %v1255_v63, %v2096_v61  ;;  %v1273_v49 = vsel %vm1267_vm5, %v1256_v0, %v2097_v60 }
 0x182   : > { %v2105_v5 = vpop.permute.xlu0 %2104  ;;  %v1289_v9 = vsel %vm1284_vm7, %v1272_v48, %v2101_v2  ;;  %v1290_v10 = vsel %vm1284_vm7, %v1273_v49, %v2102_v1 }
 0x183   : > { %v2107_v6 = vunpack.i.h.bf16 %v2105_v5  ;;  %v2106_v7 = vunpack.i.l.bf16 %v2105_v5  ;;  %v2110_v8 = vpop.permute.xlu1 %2109 }
 0x184   : > { %v2112_v11 = vunpack.i.h.bf16 %v2110_v8  ;;  %v2111_v14 = vunpack.i.l.bf16 %v2110_v8 }
 0x185   : > { %v1306_v15 = vsel %vm1301_vm8, %v1289_v9, %v2106_v7  ;;  %v1307_v39 = vsel %vm1301_vm8, %v1290_v10, %v2107_v6 }
 0x186   : > { %v2115_v40 = vpop.permute.xlu0 %2114  ;;  %v1323_v19 = vsel %vm1318_vm9, %v1306_v15, %v2111_v14  ;;  %v1324_v20 = vsel %vm1318_vm9, %v1307_v39, %v2112_v11 }
 0x187   : > { %v2117_v16 = vunpack.i.h.bf16 %v2115_v40  ;;  %v2116_v17 = vunpack.i.l.bf16 %v2115_v40  ;;  %v2120_v18 = vpop.permute.xlu1 %2119 }
 0x188   : > { %v2122_v23 = vunpack.i.h.bf16 %v2120_v18  ;;  %v2121_v24 = vunpack.i.l.bf16 %v2120_v18 }
 0x189   : > { %v1340_v25 = vsel %vm1335_vm10, %v1323_v19, %v2116_v17  ;;  %v1341_v26 = vsel %vm1335_vm10, %v1324_v20, %v2117_v16 }
 0x18a   : > { %v1357_v34 = vsel %vm1352_vm11, %v1340_v25, %v2121_v24  ;;  %v1358_v27 = vsel %vm1352_vm11, %v1341_v26, %v2122_v23  ;;  %v2125_v35 = vpop.permute.xlu0 %2124 }
 0x18b   : > { %v1877_v29 = vpack.c.bf16 %v1358_v27, %v1357_v34  ;;  %v2127_v37 = vunpack.i.h.bf16 %v2125_v35  ;;  %v2126_v30 = vunpack.i.l.bf16 %v2125_v35  ;;  %v2130_v31 = vpop.permute.xlu1 %2129 }
 0x18c   : > { %v2132_v38 = vunpack.i.h.bf16 %v2130_v31  ;;  %v2131_v32 = vunpack.i.l.bf16 %v2130_v31 }
 0x18d   : > { %v1240_v33 = vsel %vm222_vm0, %v2979_v58, %v2126_v30  ;;  %v1241_v41 = vsel %vm222_vm0, %v2982_v59, %v2127_v37  ;;  %1879 = vmatprep.subr.msk.bf16.mxu0 %vm3132_vm12, %v1877_v29 }
 0x18e   : > { %v2135_v43 = vpop.permute.xlu0 %2134  ;;  %1882 = vmatpush3.bf16.xpose.msk.msra.mxu0 %vm3132_vm12, %v1877_v29  ;;  %v1257_v47 = vsel %vm1250_vm4, %v1240_v33, %v2131_v32  ;;  %v1258_v50 = vsel %vm1250_vm4, %v1241_v41, %v2132_v38 }
 0x18f   : > { %v2137_v44 = vunpack.i.h.bf16 %v2135_v43  ;;  %v2136_v45 = vunpack.i.l.bf16 %v2135_v43  ;;  %v2140_v46 = vpop.permute.xlu1 %2139 }
 0x190   : > { %v2142_v51 = vunpack.i.h.bf16 %v2140_v46  ;;  %v2141_v52 = vunpack.i.l.bf16 %v2140_v46 }
 0x191   : > { %v1274_v58 = vsel %vm1267_vm5, %v1257_v47, %v2136_v45  ;;  %v1275_v59 = vsel %vm1267_vm5, %v1258_v50, %v2137_v44 }
 0x192   : > { %v2145_v53 = vpop.permute.xlu0 %2144  ;;  %v1291_v60 = vsel %vm1284_vm7, %v1274_v58, %v2141_v52  ;;  %v1292_v61 = vsel %vm1284_vm7, %v1275_v59, %v2142_v51 }
 0x193   : > { %v2147_v54 = vunpack.i.h.bf16 %v2145_v53  ;;  %v2146_v55 = vunpack.i.l.bf16 %v2145_v53  ;;  %v2150_v56 = vpop.permute.xlu1 %2149 }
 0x194   : > { %v2152_v62 = vunpack.i.h.bf16 %v2150_v56  ;;  %v2151_v63 = vunpack.i.l.bf16 %v2150_v56 }
 0x195   : > { %v1308_v0 = vsel %vm1301_vm8, %v1291_v60, %v2146_v55  ;;  %v1309_v1 = vsel %vm1301_vm8, %v1292_v61, %v2147_v54 }
 0x196   : > { %v2155_v2 = vpop.permute.xlu0 %2154  ;;  %v1325_v6 = vsel %vm1318_vm9, %v1308_v0, %v2151_v63  ;;  %v1326_v7 = vsel %vm1318_vm9, %v1309_v1, %v2152_v62 }
 0x197   : > { %v2157_v48 = vunpack.i.h.bf16 %v2155_v2  ;;  %v2156_v49 = vunpack.i.l.bf16 %v2155_v2  ;;  %v2160_v5 = vpop.permute.xlu1 %2159 }
 0x198   : > { %v2162_v8 = vunpack.i.h.bf16 %v2160_v5  ;;  %v2161_v9 = vunpack.i.l.bf16 %v2160_v5 }
 0x199   : > { %v1342_v10 = vsel %vm1335_vm10, %v1325_v6, %v2156_v49  ;;  %v1343_v11 = vsel %vm1335_vm10, %v1326_v7, %v2157_v48 }
 0x19a   : > { %v1359_v14 = vsel %vm1352_vm11, %v1342_v10, %v2161_v9  ;;  %v1360_v15 = vsel %vm1352_vm11, %v1343_v11, %v2162_v8  ;;  %v2165_v39 = vpop.permute.xlu0 %2164 }
 0x19b   : > { %v1883_v40 = vpack.c.bf16 %v1360_v15, %v1359_v14  ;;  %v2167_v16 = vunpack.i.h.bf16 %v2165_v39  ;;  %v2166_v17 = vunpack.i.l.bf16 %v2165_v39  ;;  %v2170_v18 = vpop.permute.xlu1 %2169 }
 0x19c   : > { %v2172_v19 = vunpack.i.h.bf16 %v2170_v18  ;;  %v2171_v20 = vunpack.i.l.bf16 %v2170_v18 }
 0x19d   : > { %v1242_v23 = vsel %vm222_vm0, %v2999_v3, %v2166_v17  ;;  %v1243_v24 = vsel %vm222_vm0, %v3002_v4, %v2167_v16  ;;  %1885 = vmatprep.subr.msk.bf16.mxu0 %vm3132_vm12, %v1883_v40 }
 0x19e   : > { %v2175_v25 = vpop.permute.xlu0 %2174  ;;  %1888 = vmatpush3.bf16.xpose.msk.msra.mxu0 %vm3132_vm12, %v1883_v40  ;;  %v1259_v35 = vsel %vm1250_vm4, %v1242_v23, %v2171_v20  ;;  %v1260_v29 = vsel %vm1250_vm4, %v1243_v24, %v2172_v19 }
 0x19f   : > { %v2177_v26 = vunpack.i.h.bf16 %v2175_v25  ;;  %v2176_v34 = vunpack.i.l.bf16 %v2175_v25  ;;  %v2180_v27 = vpop.permute.xlu1 %2179 }
 0x1a0   : > { %v2182_v37 = vunpack.i.h.bf16 %v2180_v27  ;;  %v2181_v30 = vunpack.i.l.bf16 %v2180_v27 }
 0x1a1   : > { %v1276_v3 = vsel %vm1267_vm5, %v1259_v35, %v2176_v34  ;;  %v1277_v4 = vsel %vm1267_vm5, %v1260_v29, %v2177_v26 }
 0x1a2   : > { %v2185_v31 = vpop.permute.xlu0 %2184  ;;  %v1293_v41 = vsel %vm1284_vm7, %v1276_v3, %v2181_v30  ;;  %v1294_v43 = vsel %vm1284_vm7, %v1277_v4, %v2182_v37 }
 0x1a3   : > { %v2187_v38 = vunpack.i.h.bf16 %v2185_v31  ;;  %v2186_v32 = vunpack.i.l.bf16 %v2185_v31  ;;  %v2190_v33 = vpop.permute.xlu1 %2189 }
 0x1a4   : > { %v2192_v44 = vunpack.i.h.bf16 %v2190_v33  ;;  %v2191_v45 = vunpack.i.l.bf16 %v2190_v33 }
 0x1a5   : > { %v1310_v46 = vsel %vm1301_vm8, %v1293_v41, %v2186_v32  ;;  %v1311_v47 = vsel %vm1301_vm8, %v1294_v43, %v2187_v38 }
 0x1a6   : > { %v2195_v50 = vpop.permute.xlu0 %2194  ;;  %v1327_v59 = vsel %vm1318_vm9, %v1310_v46, %v2191_v45  ;;  %v1328_v53 = vsel %vm1318_vm9, %v1311_v47, %v2192_v44 }
 0x1a7   : > { %v2197_v51 = vunpack.i.h.bf16 %v2195_v50  ;;  %v2196_v52 = vunpack.i.l.bf16 %v2195_v50  ;;  %v2200_v58 = vpop.permute.xlu1 %2199 }
 0x1a8   : > { %v2202_v54 = vunpack.i.h.bf16 %v2200_v58  ;;  %v2201_v55 = vunpack.i.l.bf16 %v2200_v58 }
 0x1a9   : > { %v1344_v56 = vsel %vm1335_vm10, %v1327_v59, %v2196_v52  ;;  %v1345_v60 = vsel %vm1335_vm10, %v1328_v53, %v2197_v51 }
 0x1aa   : > { %v1361_v61 = vsel %vm1352_vm11, %v1344_v56, %v2201_v55  ;;  %v1362_v62 = vsel %vm1352_vm11, %v1345_v60, %v2202_v54  ;;  %v2205_v63 = vpop.permute.xlu0 %2204 }
 0x1ab   : > { %v1889_v0 = vpack.c.bf16 %v1362_v62, %v1361_v61  ;;  %v2207_v1 = vunpack.i.h.bf16 %v2205_v63  ;;  %v2206_v2 = vunpack.i.l.bf16 %v2205_v63  ;;  %v2210_v48 = vpop.permute.xlu1 %2209 }
 0x1ac   : > { %v2212_v49 = vunpack.i.h.bf16 %v2210_v48  ;;  %v2211_v5 = vunpack.i.l.bf16 %v2210_v48 }
 0x1ad   : > { %v1244_v6 = vsel %vm222_vm0, %v3019_v12, %v2206_v2  ;;  %v1245_v7 = vsel %vm222_vm0, %v3022_v13, %v2207_v1  ;;  %1891 = vmatprep.subr.msk.bf16.mxu0 %vm3132_vm12, %v1889_v0 }
 0x1ae   : > { %v2215_v8 = vpop.permute.xlu0 %2214  ;;  %1894 = vmatpush3.bf16.xpose.msk.msra.mxu0 %vm3132_vm12, %v1889_v0  ;;  %v1261_v14 = vsel %vm1250_vm4, %v1244_v6, %v2211_v5  ;;  %v1262_v15 = vsel %vm1250_vm4, %v1245_v7, %v2212_v49 }
 0x1af   : > { %v2217_v9 = vunpack.i.h.bf16 %v2215_v8  ;;  %v2216_v10 = vunpack.i.l.bf16 %v2215_v8  ;;  %v2220_v11 = vpop.permute.xlu1 %2219 }
 0x1b0   : > { %v2222_v39 = vunpack.i.h.bf16 %v2220_v11  ;;  %v2221_v40 = vunpack.i.l.bf16 %v2220_v11 }
 0x1b1   : > { %v1278_v12 = vsel %vm1267_vm5, %v1261_v14, %v2216_v10  ;;  %v1279_v13 = vsel %vm1267_vm5, %v1262_v15, %v2217_v9 }
 0x1b2   : > { %v2225_v16 = vpop.permute.xlu0 %2224  ;;  %v1295_v20 = vsel %vm1284_vm7, %v1278_v12, %v2221_v40  ;;  %v1296_v23 = vsel %vm1284_vm7, %v1279_v13, %v2222_v39 }
 0x1b3   : > { %v2227_v17 = vunpack.i.h.bf16 %v2225_v16  ;;  %v2226_v18 = vunpack.i.l.bf16 %v2225_v16  ;;  %v2230_v19 = vpop.permute.xlu1 %2229 }
 0x1b4   : > { %v2232_v24 = vunpack.i.h.bf16 %v2230_v19  ;;  %v2231_v25 = vunpack.i.l.bf16 %v2230_v19 }
 0x1b5   : > { %v1312_v26 = vsel %vm1301_vm8, %v1295_v20, %v2226_v18  ;;  %v1313_v34 = vsel %vm1301_vm8, %v1296_v23, %v2227_v17 }
 0x1b6   : > { %v2235_v27 = vpop.permute.xlu0 %2234  ;;  %v1329_v30 = vsel %vm1318_vm9, %v1312_v26, %v2231_v25  ;;  %v1330_v3 = vsel %vm1318_vm9, %v1313_v34, %v2232_v24 }
 0x1b7   : > { %v2237_v35 = vunpack.i.h.bf16 %v2235_v27  ;;  %v2236_v29 = vunpack.i.l.bf16 %v2235_v27  ;;  %v2240_v37 = vpop.permute.xlu1 %2239 }
 0x1b8   : > { %v2242_v4 = vunpack.i.h.bf16 %v2240_v37  ;;  %v2241_v31 = vunpack.i.l.bf16 %v2240_v37 }
 0x1b9   : > { %v1346_v38 = vsel %vm1335_vm10, %v1329_v30, %v2236_v29  ;;  %v1347_v32 = vsel %vm1335_vm10, %v1330_v3, %v2237_v35 }
 0x1ba   : > { %v1363_v33 = vsel %vm1352_vm11, %v1346_v38, %v2241_v31  ;;  %v1364_v41 = vsel %vm1352_vm11, %v1347_v32, %v2242_v4  ;;  %v2245_v43 = vpop.permute.xlu0 %2244 }
 0x1bb   : > { %v1895_v44 = vpack.c.bf16 %v1364_v41, %v1363_v33  ;;  %v2247_v45 = vunpack.i.h.bf16 %v2245_v43  ;;  %v2246_v46 = vunpack.i.l.bf16 %v2245_v43  ;;  %v2250_v47 = vpop.permute.xlu1 %2249 }
 0x1bc   : > { %v2252_v50 = vunpack.i.h.bf16 %v2250_v47  ;;  %v2251_v51 = vunpack.i.l.bf16 %v2250_v47 }
 0x1bd   : > { %v1246_v52 = vsel %vm222_vm0, %v3039_v21, %v2246_v46  ;;  %v1247_v58 = vsel %vm222_vm0, %v3042_v22, %v2247_v45  ;;  %1897 = vmatprep.subr.msk.bf16.mxu0 %vm3132_vm12, %v1895_v44 }
 0x1be   : > { %v2255_v59 = vpop.permute.xlu0 %2254  ;;  %1900 = vmatpush3.bf16.xpose.msk.msra.mxu0 %vm3132_vm12, %v1895_v44  ;;  %v1263_v56 = vsel %vm1250_vm4, %v1246_v52, %v2251_v51  ;;  %v1264_v60 = vsel %vm1250_vm4, %v1247_v58, %v2252_v50 }
 0x1bf   : > { %v2257_v53 = vunpack.i.h.bf16 %v2255_v59  ;;  %v2256_v54 = vunpack.i.l.bf16 %v2255_v59  ;;  %v2260_v55 = vpop.permute.xlu1 %2259 }
 0x1c0   : > { %v2262_v61 = vunpack.i.h.bf16 %v2260_v55  ;;  %v2261_v62 = vunpack.i.l.bf16 %v2260_v55 }
 0x1c1   : > { %v1280_v21 = vsel %vm1267_vm5, %v1263_v56, %v2256_v54  ;;  %v1281_v22 = vsel %vm1267_vm5, %v1264_v60, %v2257_v53 }
 0x1c2   : > { %v2265_v63 = vpop.permute.xlu0 %2264  ;;  %v1297_v48 = vsel %vm1284_vm7, %v1280_v21, %v2261_v62  ;;  %v1298_v49 = vsel %vm1284_vm7, %v1281_v22, %v2262_v61 }
 0x1c3   : > { %v2267_v0 = vunpack.i.h.bf16 %v2265_v63  ;;  %v2266_v1 = vunpack.i.l.bf16 %v2265_v63  ;;  %v2270_v2 = vpop.permute.xlu1 %2269 }
 0x1c4   : > { %v2272_v5 = vunpack.i.h.bf16 %v2270_v2  ;;  %v2271_v6 = vunpack.i.l.bf16 %v2270_v2  ;;  %v1503_v2 = vlaneseq }
 0x1c5   : > { %v1314_v7 = vsel %vm1301_vm8, %v1297_v48, %v2266_v1  ;;  %v1315_v8 = vsel %vm1301_vm8, %v1298_v49, %v2267_v0  ;;  %v1370_v1 = vld [vmem:[%s3400_s1 + $0x8] sm:$0x1] }
 0x1c6   : > { %v2275_v9 = vpop.permute.xlu0 %2274  ;;  %v1331_v15 = vsel %vm1318_vm9, %v1314_v7, %v2271_v6  ;;  %v1332_v39 = vsel %vm1318_vm9, %v1315_v8, %v2272_v5  ;;  %v1504_v48 = vshrl.u32 %v1503_v2, 7  ;;  %v2465_v7 = vmov 1.0  }
 0x1c7   : > { %v2277_v10 = vunpack.i.h.bf16 %v2275_v9  ;;  %v2276_v11 = vunpack.i.l.bf16 %v2275_v9  ;;  %v2280_v14 = vpop.permute.xlu1 %2279 }
 0x1c8   : > { %v2282_v40 = vunpack.i.h.bf16 %v2280_v14  ;;  %v2281_v12 = vunpack.i.l.bf16 %v2280_v14  ;;  %v1505_v57 = vsub.s32 0, %v1504_v48 }
 0x1c9   : > { %v1348_v13 = vsel %vm1335_vm10, %v1331_v15, %v2276_v11  ;;  %v1349_v16 = vsel %vm1335_vm10, %v1332_v39, %v2277_v10 }
 0x1ca   : > { %v1365_v17 = vsel %vm1352_vm11, %v1348_v13, %v2281_v12  ;;  %v1366_v18 = vsel %vm1352_vm11, %v1349_v16, %v2282_v40  ;;  %v2285_v19 = vpop.permute.xlu0 %2284 }
 0x1cb   : > { %v1901_v20 = vpack.c.bf16 %v1366_v18, %v1365_v17  ;;  %v2287_v23 = vunpack.i.h.bf16 %v2285_v19  ;;  %v2286_v24 = vunpack.i.l.bf16 %v2285_v19  ;;  %v2290_v25 = vpop.permute.xlu1 %2289 }
 0x1cc   : > { %v2292_v26 = vunpack.i.h.bf16 %v2290_v25  ;;  %v2291_v34 = vunpack.i.l.bf16 %v2290_v25 }
 0x1cd   : > { %v1248_v27 = vsel %vm222_vm0, %v3059_v28, %v2286_v24  ;;  %v1249_v35 = vsel %vm222_vm0, %v3062_v36, %v2287_v23  ;;  %1903 = vmatprep.subr.msk.bf16.mxu0 %vm3132_vm12, %v1901_v20 }
 0x1ce   : > { %v2295_v29 = vpop.permute.xlu0 %2294  ;;  %1906 = vmatpush3.bf16.xpose.msk.msra.mxu0 %vm3132_vm12, %v1901_v20  ;;  %v1265_v4 = vsel %vm1250_vm4, %v1248_v27, %v2291_v34  ;;  %v1266_v31 = vsel %vm1250_vm4, %v1249_v35, %v2292_v26 }
 0x1cf   : > { %v2297_v37 = vunpack.i.h.bf16 %v2295_v29  ;;  %v2296_v30 = vunpack.i.l.bf16 %v2295_v29  ;;  %v2300_v3 = vpop.permute.xlu1 %2299 }
 0x1d0   : > { %v2302_v38 = vunpack.i.h.bf16 %v2300_v3  ;;  %v2301_v32 = vunpack.i.l.bf16 %v2300_v3 }
 0x1d1   : > { %v1282_v28 = vsel %vm1267_vm5, %v1265_v4, %v2296_v30  ;;  %v1283_v36 = vsel %vm1267_vm5, %v1266_v31, %v2297_v37 }
 0x1d2   : > { %v2305_v33 = vpop.permute.xlu0 %2304  ;;  %v1299_v45 = vsel %vm1284_vm7, %v1282_v28, %v2301_v32  ;;  %v1300_v46 = vsel %vm1284_vm7, %v1283_v36, %v2302_v38 }
 0x1d3   : > { %v2307_v41 = vunpack.i.h.bf16 %v2305_v33  ;;  %v2306_v43 = vunpack.i.l.bf16 %v2305_v33  ;;  %v2310_v44 = vpop.permute.xlu1 %2309 }
 0x1d4   : > { %v2312_v47 = vunpack.i.h.bf16 %v2310_v44  ;;  %v2311_v50 = vunpack.i.l.bf16 %v2310_v44 }
 0x1d5   : > { %v1316_v51 = vsel %vm1301_vm8, %v1299_v45, %v2306_v43  ;;  %v1317_v52 = vsel %vm1301_vm8, %v1300_v46, %v2307_v41 }
 0x1d6   : > { %v2315_v58 = vpop.permute.xlu0 %2314  ;;  %v1333_v55 = vsel %vm1318_vm9, %v1316_v51, %v2311_v50  ;;  %v1334_v56 = vsel %vm1318_vm9, %v1317_v52, %v2312_v47 }
 0x1d7   : > { %v2317_v59 = vunpack.i.h.bf16 %v2315_v58  ;;  %v2316_v53 = vunpack.i.l.bf16 %v2315_v58  ;;  %v2320_v54 = vpop.permute.xlu1 %2319 }
 0x1d8   : > { %v2322_v60 = vunpack.i.h.bf16 %v2320_v54  ;;  %v2321_v61 = vunpack.i.l.bf16 %v2320_v54 }
 0x1d9   : > { %v1350_v62 = vsel %vm1335_vm10, %v1333_v55, %v2316_v53  ;;  %v1351_v21 = vsel %vm1335_vm10, %v1334_v56, %v2317_v59 }
 0x1da   : > { %v1367_v22 = vsel %vm1352_vm11, %v1350_v62, %v2321_v61  ;;  %v1368_v63 = vsel %vm1352_vm11, %v1351_v21, %v2322_v60 }
 0x1db   : > { %v1907_v0 = vpack.c.bf16 %v1368_v63, %v1367_v22 }
 0x1dd   : > { %1909 = vmatprep.subr.msk.bf16.mxu0 %vm3132_vm12, %v1907_v0 }
 0x1de   : > { %1912 = vmatpush3.bf16.xpose.msk.msra.mxu0 %vm3132_vm12, %v1907_v0 }
 0x1e5   : > { %1863 = vmatmul.mubr.msk.f32.vlgmr.msra.gmra.mrb[0].mxu0 %vm1371_vm6, %v1370_v1 }
 0x2b8   : > { %v1864_v49 = vpop.f32.mrb[0].mxu0 }
 0x2b9   : > { %vm1501_vm13 = vcmp.eq.f32.partialorder %v1864_v49, 0.0  ;;  %v1492_v5 = vpop.f32.mrb[1].mxu0 }
 0x2ba   : > { %v1502_v6 = vsel %vm1501_vm13, 1.0, %v1864_v49  ;;  %v1527_v8 = vsel %vm1501_vm13, 0.0, %v2465_v7 }
 0x2bb   : > { %v1506_v9 = vrot.slane %v1502_v6, %v1505_v57  ;;  %1528 = vst [vmem:[%s216_s6] sm:$0x1] %v1527_v8 }
 0x2bc   : > { %2339 = shalt.err (!%p2336_p6)
}
 0x2bd   : > { %s2340_s23 = scalar_lea.hbm %s3310_s19, 16  ;;  %s2344_s6 = scalar_lea.hbm %s3403_s4, 64 }
 0x2be   : > { %p2341_p7 = scmp.ne.s32.totalorder %s3310_s19, %s2340_s23  ;;  %p2345_p11 = scmp.lt.u32.totalorder %s3310_s19, %s3403_s4 }
 0x2bf   : > { %p2346_p12 = scmp.lt.u32.totalorder %s2344_s6, %s2340_s23  ;;  %p2348_p0 = scmp.lt.u32.totalorder %s2340_s23, %s3310_s19 }
 0x2c0   : > { %p2342_p9 = pnand %p2341_p7, %p2544_p3 }
 0x2c1   : > { %p2347_p13 = por %p2346_p12, %p2345_p11 }
 0x2c2   : > { %p2343_p10 = pneg %p2342_p9 }
 0x2c3   : > { %p2349_p1 = por %p2348_p0, %p2347_p13 }
 0x2c5   : > { %p2350_p2 = pnand %p2349_p1, %p2343_p10 }
 0x2c7   : > { %2353 = shalt.err (!%p2350_p2)
}
 0x2c8   : > { %1914 = dma.vmem_to_hbm [thread:$0]  (%p2544_p3), %s3312_s8, 16, %s3310_s19, %s1535_s18   ;;  %2324 = vrcp.f32 %v1506_v9  ;;  %v1516_v10 = vsel %vm1501_vm13, 1, %v2464_v42  ;;  %v1513_v14 = vpop.permute.xlu0 %1512 }
 0x2c9   : > { %s1681_s11 = sshll.u32 %s3300_s27, 3  ;;  %v1520_v15 = vrot.slane %v1516_v10, %v1505_v57  ;;  %s1806_s12 = sshll.u32 %s3303_s30, 7 }
 0x2ca   : > { %s210_s13 = scalar_lea.vmem [#allocation3], %s1681_s11  ;;  %s3345_s18 = scalar_lea.hbm %s3402_s3, %s1806_s12 }
 0x2cb   : > { %vm1521_vm14 = vcmp.eq.s32.totalorder %v1520_v15, 1  ;;  %s1549_s14 = sshll.u32 %s210_s13, 4  ;;  %s1530_s23 = scalar_lea.sflag [#allocation4], %s3300_s27  ;;  %s3347_s14 = int_to_ptr.vmem [resolvable:$true] %s1549_s14 }
 0x2cc   : > { %s2354_s24 = scalar_lea.vmem %s3347_s14, 128  ;;  %s2467_s30 = smov [#allocation3]  }
 0x2cd   : > { %p2355_p4 = scmp.ne.s32.totalorder %s3347_s14, %s2354_s24  ;;  %s2358_s5 = sshll.u32 %s2467_s30, 4  ;;  %s2359_s5 = int_to_ptr.vmem [resolvable:$false] %s2358_s5 }
 0x2ce   : > { %s2360_s6 = scalar_lea.vmem %s2359_s5, 256  ;;  %p2361_p7 = scmp.lt.s32.totalorder %s3347_s14, %s2359_s5 }
 0x2cf   : > { %p2356_p5 = pnand %p2355_p4, %p2544_p3  ;;  %p2362_p9 = scmp.lt.s32.totalorder %s2360_s6, %s2354_s24 }
 0x2d1   : > { %p2357_p6 = pneg %p2356_p5  ;;  %p2363_p10 = por %p2362_p9, %p2361_p7 }
 0x2d2   : > { %v2325_v11 = vpop.eup %2324 }
 0x2d3   : > { %v1508_v39 = vmul.f32 %v2325_v11, %v1492_v5  ;;  %p2364_p11 = pnand %p2363_p10, %p2357_p6 }
 0x2d5   : > { %v1515_v40 = vadd.f32 %v1513_v14, %v1508_v39 }
 0x2d7   : > { %v1522_v12 = vsel %vm1521_vm14, 0.0, %v1515_v40 }
 0x2d8   : > { %vm1523_vm15 = vcmp.gt.f32.partialorder %v1522_v12, 0.0  ;;  %v1524_v13 = vmul.f32 0.2, %v1522_v12 }
 0x2da   : > { %v1525_v42 = vsel %vm1523_vm15, %v1522_v12, %v1524_v13 }
 0x2db   : > { %1526 = vst [vmem:[%s210_s13] sm:$0xff] %v1525_v42 }
 0x2dc   : > { %2367 = shalt.err (!%p2364_p11)
}
 0x2dd   : > { %s2368_s27 = scalar_lea.hbm %s3345_s18, 128  ;;  %s2372_s11 = scalar_lea.hbm %s3402_s3, 512 }
 0x2de   : > { %p2369_p12 = scmp.ne.s32.totalorder %s3345_s18, %s2368_s27  ;;  %p2373_p1 = scmp.lt.u32.totalorder %s3345_s18, %s3402_s3 }
 0x2df   : > { %p2374_p2 = scmp.lt.u32.totalorder %s2372_s11, %s2368_s27  ;;  %p2376_p5 = scmp.lt.u32.totalorder %s2368_s27, %s3345_s18 }
 0x2e0   : > { %p2370_p13 = pnand %p2369_p12, %p2544_p3 }
 0x2e1   : > { %p2375_p4 = por %p2374_p2, %p2373_p1 }
 0x2e2   : > { %p2371_p0 = pneg %p2370_p13 }
 0x2e3   : > { %p2377_p6 = por %p2376_p5, %p2375_p4 }
 0x2e5   : > { %p2378_p7 = pnand %p2377_p6, %p2371_p0 }
 0x2e7   : > { %2381 = shalt.err (!%p2378_p7)
}
 0x2e8   : > { %1913 = dma.vmem_to_hbm [thread:$0]  (%p2544_p3), %s3347_s14, 128, %s3345_s18, %s1530_s23  }
 0x2e9 PF: > { %p1924_p9 = scmp.ge.s32.totalorder %s2452_s22, 2  ;;  %s1576_s8 = sand.u32 1, %s2424_s15  }
 0x2ea   : > { %s1577_s19 = scalar_lea.sflag [#allocation4], %s1576_s8 }
 0x2eb   : > { %p1918_p10 = pnand %p1924_p9, %p2553_p8 }
 0x2ed   : > { %2415 = dma.done.wait (!%p1918_p10), %s1577_s19, 128  }
 0x2ee   : > { %2417 = vsyncadd (!%p1918_p10), %s1577_s19, 4294967168  ;;  %s1586_s24 = scalar_lea.sflag [#allocation6], %s1576_s8 }
 0x2ef   : > { %2419 = dma.done.wait (!%p1918_p10), %s1586_s24, 16  }
 0x2f0   : > { %2421 = vsyncadd (!%p1918_p10), %s1586_s24, 4294967280  ;;  %s21_s22 = sadd.s32 1, %s2452_s22   ;;  %s3408_s15 = smov %s2428_s16 }
 0x2f1   : > { %p18_p11 = scmp.ge.s32.totalorder %s21_s22, 6   ;;  %s3409_s16 = smov %s2432_s17 }
 0x2f2   : > { %s3410_s17 = smov %s2562_s7  ;;  %s3411_s18 = smov %s2444_s20 }
 0x2f3   : > { %s3412_s19 = smov %s2448_s21  ;;  %s3413_s20 = smov %s3416_s25 }
 0x2f4   : > { %s3414_s21 = smov %s3420_s26  ;;  %20 = sbr.rel (!%p18_p11) target bundleno = 7 (0x7), region = 88 }
 0x2fb   :  { %1590 = vsyncpa [#allocation4], 1 }
 0x2fc   :  { %1592 = vsyncpa [#allocation4 + $0x1], 1 }
 0x2fd   :  { %1593 = vsyncpa [#allocation6], 1 }
 0x2fe   :  { %1595 = vsyncpa [#allocation6 + $0x1], 1 }

</bundles_post_ra>
